<compile_context>
chip_gen: v7x
topology: tpu7x:2x2x1
jax: 0.10.0
libtpu: 0.0.40
codegen_flags: <defaults>
</compile_context>

<pallas_src>
import functools

import jax
import jax.numpy as jnp
from jax.experimental import pallas as pl
from jax.experimental.pallas import tpu as pltpu

EPS = 1e-5
LANE = 128

_VMEM_LIMIT = 32 * 1024 * 1024  # safe on v5e (128 MiB), v6e (128 MiB), v7x (64 MiB)

_PARAMS_ACC = pltpu.CompilerParams(                 # stats pass: accumulates across M tiles
    dimension_semantics=("arbitrary",), vmem_limit_bytes=_VMEM_LIMIT)
_PARAMS_PAR = pltpu.CompilerParams(                 # normalize pass: independent tiles
    dimension_semantics=("parallel",), vmem_limit_bytes=_VMEM_LIMIT)


def _round_up(x, m):
    return (x + m - 1) // m * m


# ----------------------------------------------------------------------------
# Pallas kernels
# ----------------------------------------------------------------------------
def _stats_kernel(p_ref, w_ref, sum_ref, sq_ref):
    """Pass 1: accumulate per-channel sum / sum-of-squares of y = p @ w."""
    @pl.when(pl.program_id(0) == 0)
    def _():
        sum_ref[...] = jnp.zeros_like(sum_ref)
        sq_ref[...] = jnp.zeros_like(sq_ref)

    y = jnp.dot(p_ref[...], w_ref[...], preferred_element_type=jnp.float32)
    sum_ref[...] += jnp.sum(y, axis=0, keepdims=True)
    sq_ref[...] += jnp.sum(y * y, axis=0, keepdims=True)


def _stats2_kernel(p_ref, w_ref, s_ref, w3_ref,
                   sum2_ref, sq2_ref, sum3_ref, sq3_ref):
    """Pass 1 for stage 2: stats of conv2 AND the fused 1x1 shortcut in one sweep."""
    @pl.when(pl.program_id(0) == 0)
    def _():
        sum2_ref[...] = jnp.zeros_like(sum2_ref)
        sq2_ref[...] = jnp.zeros_like(sq2_ref)
        sum3_ref[...] = jnp.zeros_like(sum3_ref)
        sq3_ref[...] = jnp.zeros_like(sq3_ref)

    y2 = jnp.dot(p_ref[...], w_ref[...], preferred_element_type=jnp.float32)
    y3 = jnp.dot(s_ref[...], w3_ref[...], preferred_element_type=jnp.float32)
    sum2_ref[...] += jnp.sum(y2, axis=0, keepdims=True)
    sq2_ref[...] += jnp.sum(y2 * y2, axis=0, keepdims=True)
    sum3_ref[...] += jnp.sum(y3, axis=0, keepdims=True)
    sq3_ref[...] += jnp.sum(y3 * y3, axis=0, keepdims=True)


def _norm_kernel(p_ref, w_ref, ab_ref, o_ref, *, relu):
    """Pass 2: y = p @ w, folded BN affine (y*scale+shift), optional ReLU."""
    y = jnp.dot(p_ref[...], w_ref[...], preferred_element_type=jnp.float32)
    out = y * ab_ref[0:1, :] + ab_ref[1:2, :]
    if relu:
        out = jnp.maximum(out, 0.0)
    o_ref[...] = out.astype(o_ref.dtype)


def _norm_res_kernel(p_ref, w_ref, ab_ref, s_ref, w3_ref, ab3_ref, o_ref):
    """Pass 2 for stage 2: conv2+bn2, fused shortcut conv3+bn3, add, ReLU."""
    y2 = jnp.dot(p_ref[...], w_ref[...], preferred_element_type=jnp.float32)
    y3 = jnp.dot(s_ref[...], w3_ref[...], preferred_element_type=jnp.float32)
    out = (y2 * ab_ref[0:1, :] + ab_ref[1:2, :]) \
        + (y3 * ab3_ref[0:1, :] + ab3_ref[1:2, :])
    out = jnp.maximum(out, 0.0)
    o_ref[...] = out.astype(o_ref.dtype)


# ----------------------------------------------------------------------------
# pallas_call wrappers (M-tiled grids; weights / BN affines stay resident)
# ----------------------------------------------------------------------------
def _conv_stats(p, w, tm):
    mp, k = p.shape
    _, cp = w.shape
    return pl.pallas_call(
        _stats_kernel,
        out_shape=(jax.ShapeDtypeStruct((1, cp), jnp.float32),
                   jax.ShapeDtypeStruct((1, cp), jnp.float32)),
        grid=(mp // tm,),
        in_specs=[pl.BlockSpec((tm, k), lambda i: (i, 0)),
                  pl.BlockSpec((k, cp), lambda i: (0, 0))],
        out_specs=(pl.BlockSpec((1, cp), lambda i: (0, 0)),
                   pl.BlockSpec((1, cp), lambda i: (0, 0))),
        compiler_params=_PARAMS_ACC,
    )(p, w)


def _conv_res_stats(p, w, s, w3, tm):
    mp, k = p.shape
    _, cp = w.shape
    _, ks = s.shape
    return pl.pallas_call(
        _stats2_kernel,
        out_shape=tuple(jax.ShapeDtypeStruct((1, cp), jnp.float32) for _ in range(4)),
        grid=(mp // tm,),
        in_specs=[pl.BlockSpec((tm, k), lambda i: (i, 0)),
                  pl.BlockSpec((k, cp), lambda i: (0, 0)),
                  pl.BlockSpec((tm, ks), lambda i: (i, 0)),
                  pl.BlockSpec((ks, cp), lambda i: (0, 0))],
        out_specs=tuple(pl.BlockSpec((1, cp), lambda i: (0, 0)) for _ in range(4)),
        compiler_params=_PARAMS_ACC,
    )(p, w, s, w3)


def _conv_norm(p, w, ab, tm, relu):
    mp, k = p.shape
    _, cp = w.shape
    return pl.pallas_call(
        functools.partial(_norm_kernel, relu=relu),
        out_shape=jax.ShapeDtypeStruct((mp, cp), jnp.float32),
        grid=(mp // tm,),
        in_specs=[pl.BlockSpec((tm, k), lambda i: (i, 0)),
                  pl.BlockSpec((k, cp), lambda i: (0, 0)),
                  pl.BlockSpec((2, cp), lambda i: (0, 0))],
        out_specs=pl.BlockSpec((tm, cp), lambda i: (i, 0)),
        compiler_params=_PARAMS_PAR,
    )(p, w, ab)


def _conv_res_norm(p, w, ab, s, w3, ab3, tm):
    mp, k = p.shape
    _, cp = w.shape
    _, ks = s.shape
    return pl.pallas_call(
        _norm_res_kernel,
        out_shape=jax.ShapeDtypeStruct((mp, cp), jnp.float32),
        grid=(mp // tm,),
        in_specs=[pl.BlockSpec((tm, k), lambda i: (i, 0)),
                  pl.BlockSpec((k, cp), lambda i: (0, 0)),
                  pl.BlockSpec((2, cp), lambda i: (0, 0)),
                  pl.BlockSpec((tm, ks), lambda i: (i, 0)),
                  pl.BlockSpec((ks, cp), lambda i: (0, 0)),
                  pl.BlockSpec((2, cp), lambda i: (0, 0))],
        out_specs=pl.BlockSpec((tm, cp), lambda i: (i, 0)),
        compiler_params=_PARAMS_PAR,
    )(p, w, ab, s, w3, ab3)


# ----------------------------------------------------------------------------
# Plain-JAX glue: im2col, weight repacking, BN stat -> affine folding
# ----------------------------------------------------------------------------
def im2col(x_nhwc, ksize, stride, padding):
    n, h, w, c = x_nhwc.shape
    ho = (h + 2 * padding - ksize) // stride + 1
    wo = (w + 2 * padding - ksize) // stride + 1
    xp = jnp.pad(x_nhwc, ((0, 0), (padding, padding), (padding, padding), (0, 0)))
    cols = []
    for kh in range(ksize):
        for kw in range(ksize):
            cols.append(xp[:, kh:kh + stride * ho:stride, kw:kw + stride * wo:stride, :])
    patches = jnp.stack(cols, axis=3).reshape(n * ho * wo, ksize * ksize * c)
    return patches, (n, ho, wo)


def repack_weight(w_oihw, cpad):
    """torch [Cout, Cin, kh, kw] -> [kh*kw*Cin, Cpad] (zero-padded output channels)."""
    cout, cin, kh, kw = w_oihw.shape
    w = jnp.transpose(w_oihw, (2, 3, 1, 0)).reshape(kh * kw * cin, cout)
    return jnp.pad(w, ((0, 0), (0, cpad - cout)))


def _pad_rows(a, mp):
    return jnp.pad(a, ((0, mp - a.shape[0]), (0, 0)))


def _pad_vec(v, cpad):
    return jnp.pad(v.astype(jnp.float32), (0, cpad - v.shape[0]))


def _bn_affine(sum_, sq_, m_real, gamma_pad, beta_pad):
    """Fold batch-stat BatchNorm into per-channel (scale, shift); tiny [Cpad] op."""
    mean = sum_ / m_real                                    # (1, Cpad)
    var = jnp.maximum(sq_ / m_real - mean * mean, 0.0)      # one-pass variance
    inv = jax.lax.rsqrt(var + EPS)
    scale = gamma_pad[None, :] * inv
    shift = beta_pad[None, :] - mean * scale
    return jnp.concatenate([scale, shift], axis=0)          # (2, Cpad) f32


# ----------------------------------------------------------------------------
# Full BasicBlock2 forward
# ----------------------------------------------------------------------------
def basic_block2_forward(x_nchw, params, *, matmul_dtype=jnp.bfloat16, max_tile_m=256):
    x = jnp.transpose(x_nchw, (0, 2, 3, 1)).astype(jnp.float32)   # NHWC
    n, h, w, cin = x.shape
    cout = params["w1"].shape[0]
    cpad = max(LANE, _round_up(cout, LANE))                 # lane-dense output channels

    # ---- stage 1: conv1 (3x3, s2, p1) + bn1 + relu -------------------------
    p1, (n1, ho, wo) = im2col(x, 3, 2, 1)
    m = n1 * ho * wo
    tm = min(max_tile_m, _round_up(m, 8))
    mp = _round_up(m, tm)                                   # zero rows contribute 0 to stats
    p1 = _pad_rows(p1, mp).astype(matmul_dtype)
    w1 = repack_weight(params["w1"], cpad).astype(matmul_dtype)

    s1, q1 = _conv_stats(p1, w1, tm)
    ab1 = _bn_affine(s1, q1, float(m), _pad_vec(params["g1"], cpad),
                     _pad_vec(params["b1"], cpad))
    h1 = _conv_norm(p1, w1, ab1, tm, relu=True)             # (Mp, Cpad) f32
    h1 = h1[:m, :cout].reshape(n1, ho, wo, cout)

    # ---- stage 2: conv2 (3x3, s1, p1) + bn2, fused shortcut conv3 (1x1, s2)
    #      + bn3, residual add, relu ----------------------------------------
    p2, _ = im2col(h1, 3, 1, 1)
    p2 = _pad_rows(p2, mp).astype(matmul_dtype)
    w2 = repack_weight(params["w2"], cpad).astype(matmul_dtype)

    sc = x[:, ::2, ::2, :].reshape(m, cin)                  # 1x1 stride-2 "patches"
    sc = _pad_rows(sc, mp).astype(matmul_dtype)
    w3 = jnp.pad(params["w3"][:, :, 0, 0].T, ((0, 0), (0, cpad - cout))).astype(matmul_dtype)

    s2, q2, s3, q3 = _conv_res_stats(p2, w2, sc, w3, tm)
    ab2 = _bn_affine(s2, q2, float(m), _pad_vec(params["g2"], cpad),
                     _pad_vec(params["b2"], cpad))
    ab3 = _bn_affine(s3, q3, float(m), _pad_vec(params["g3"], cpad),
                     _pad_vec(params["b3"], cpad))
    out = _conv_res_norm(p2, w2, ab2, sc, w3, ab3, tm)      # (Mp, Cpad) f32
    out = out[:m, :cout].reshape(n1, ho, wo, cout)
    return jnp.transpose(out, (0, 3, 1, 2))                 # NCHW


# ----------------------------------------------------------------------------
# Pure-JAX reference (correctness sanity check)
# ----------------------------------------------------------------------------
def reference_forward(x, params):
    def conv(xx, w, stride, pad):
        return jax.lax.conv_general_dilated(
            xx, w, (stride, stride), [(pad, pad), (pad, pad)],
            dimension_numbers=("NCHW", "OIHW", "NCHW"))

    def bn(y, g, b):
        m = y.mean(axis=(0, 2, 3), keepdims=True)
        v = ((y - m) ** 2).mean(axis=(0, 2, 3), keepdims=True)
        return ((y - m) * jax.lax.rsqrt(v + EPS) * g.reshape(1, -1, 1, 1)
                + b.reshape(1, -1, 1, 1))

    identity = bn(conv(x, params["w3"], 2, 0), params["g3"], params["b3"])
    hh = jax.nn.relu(bn(conv(x, params["w1"], 2, 1), params["g1"], params["b1"]))
    hh = bn(conv(hh, params["w2"], 1, 1), params["g2"], params["b2"])
    return jax.nn.relu(hh + identity)


if __name__ == "__main__":
    key = jax.random.PRNGKey(0)
    in_channel, out_channel = 4, 8
    N, H, W = 2, 16, 16

    ks = jax.random.split(key, 8)
    x = jax.random.normal(ks[0], (N, in_channel, H, W), jnp.float32)
    params = {
        "w1": 0.1 * jax.random.normal(ks[1], (out_channel, in_channel, 3, 3), jnp.float32),
        "w2": 0.1 * jax.random.normal(ks[2], (out_channel, out_channel, 3, 3), jnp.float32),
        "w3": 0.1 * jax.random.normal(ks[3], (out_channel, in_channel, 1, 1), jnp.float32),
        "g1": 1.0 + 0.1 * jax.random.normal(ks[4], (out_channel,), jnp.float32),
        "b1": 0.1 * jax.random.normal(ks[5], (out_channel,), jnp.float32),
        "g2": 1.0 + 0.1 * jax.random.normal(ks[6], (out_channel,), jnp.float32),
        "b2": 0.1 * jax.random.normal(ks[7], (out_channel,), jnp.float32),
        "g3": jnp.ones((out_channel,), jnp.float32),
        "b3": jnp.zeros((out_channel,), jnp.float32),
    }

    ref = jax.block_until_ready(reference_forward(x, params))

    # f32-operand path with a small tile (grid of 2) to strictly verify the
    # cross-tile two-pass BatchNorm reduction.
    fwd_f32 = jax.jit(functools.partial(basic_block2_forward,
                                        matmul_dtype=jnp.float32, max_tile_m=64))
    out_f32 = jax.block_until_ready(fwd_f32(x, params))
    assert out_f32.shape == (N, out_channel, H // 2, W // 2), out_f32.shape
    assert jnp.allclose(out_f32, ref, rtol=1e-3, atol=1e-3), \
        float(jnp.max(jnp.abs(out_f32 - ref)))

    # performance path: bf16 MXU operands, f32 accumulation / BN math.
    fwd_bf16 = jax.jit(functools.partial(basic_block2_forward,
                                         matmul_dtype=jnp.bfloat16))
    out_bf16 = jax.block_until_ready(fwd_bf16(x, params))
    assert out_bf16.shape == (N, out_channel, H // 2, W // 2), out_bf16.shape
    assert jnp.allclose(out_bf16, ref, rtol=3e-2, atol=3e-2), \
        float(jnp.max(jnp.abs(out_bf16 - ref)))

    print("KERNEL_OK")
</pallas_src>

<mosaic_0001>
module attributes {stable_mosaic.version = 11 : i64} {
  func.func @_stats_kernel(%arg0: i32, %arg1: memref<64x36xf32, #tpu.memory_space<vmem>>, %arg2: memref<36x128xf32, #tpu.memory_space<vmem>>, %arg3: memref<1x128xf32, #tpu.memory_space<vmem>>, %arg4: memref<1x128xf32, #tpu.memory_space<vmem>>) attributes {dimension_semantics = [#tpu.dimension_semantics<arbitrary>], iteration_bounds = array<i64: 2>, scalar_prefetch = 0 : i64, scratch_operands = 0 : i64, tpu.core_type = #tpu.core_type<tc>, window_params = [{transform_indices = @transform_0, window_bounds = array<i64: 64, 36>}, {pipeline_mode = #tpu.pipeline_mode<synchronous>, transform_indices = @transform_1, window_bounds = array<i64: 36, 128>}, {pipeline_mode = #tpu.pipeline_mode<synchronous>, transform_indices = @transform_2, window_bounds = array<i64: 1, 128>}, {pipeline_mode = #tpu.pipeline_mode<synchronous>, transform_indices = @transform_3, window_bounds = array<i64: 1, 128>}]} {
    %c0_i32 = arith.constant 0 : i32
    %0 = arith.cmpi eq, %arg0, %c0_i32 : i32
    %1 = arith.extui %0 : i1 to i32
    %c0_i32_0 = arith.constant 0 : i32
    %2 = arith.cmpi ne, %1, %c0_i32_0 : i32
    scf.if %2 {
      %cst_14 = arith.constant 0.000000e+00 : f32
      %17 = vector.broadcast %cst_14 : f32 to vector<1x128xf32>
      %c0_15 = arith.constant 0 : index
      %c0_16 = arith.constant 0 : index
      %18 = vector.load %arg3[%c0_15, %c0_16] : memref<1x128xf32, #tpu.memory_space<vmem>>, vector<1x128xf32>
      tpu.vector_store %arg3[%c0_15, %c0_16], %17 {strides = array<i32>} : memref<1x128xf32, #tpu.memory_space<vmem>>, vector<1x128xf32>,
      %cst_17 = arith.constant 0.000000e+00 : f32
      %19 = vector.broadcast %cst_17 : f32 to vector<1x128xf32>
      %c0_18 = arith.constant 0 : index
      %c0_19 = arith.constant 0 : index
      %20 = vector.load %arg4[%c0_18, %c0_19] : memref<1x128xf32, #tpu.memory_space<vmem>>, vector<1x128xf32>
      tpu.vector_store %arg4[%c0_18, %c0_19], %19 {strides = array<i32>} : memref<1x128xf32, #tpu.memory_space<vmem>>, vector<1x128xf32>,
    } else {
    }
    %c0 = arith.constant 0 : index
    %c0_1 = arith.constant 0 : index
    %3 = vector.load %arg1[%c0, %c0_1] : memref<64x36xf32, #tpu.memory_space<vmem>>, vector<64x36xf32>
    %c0_2 = arith.constant 0 : index
    %c0_3 = arith.constant 0 : index
    %4 = vector.load %arg2[%c0_2, %c0_3] : memref<36x128xf32, #tpu.memory_space<vmem>>, vector<36x128xf32>
    %cst = arith.constant dense<0.000000e+00> : vector<64x128xf32>
    %5 = tpu.matmul %3, %4, %cst {dimension_numbers = #tpu.dot_dimension_numbers<[1], [0], [0], [1], [0, 0, 1, 1], [], []>} : vector<64x36xf32>, vector<36x128xf32>, vector<64x128xf32> -> vector<64x128xf32>
    %c0_4 = arith.constant 0 : index
    %c0_5 = arith.constant 0 : index
    %6 = vector.load %arg3[%c0_4, %c0_5] : memref<1x128xf32, #tpu.memory_space<vmem>>, vector<1x128xf32>
    %cst_6 = arith.constant dense<0.000000e+00> : vector<128xf32>
    %7 = vector.multi_reduction <add>, %5, %cst_6 [0] : vector<64x128xf32> to vector<128xf32>
    %8 = vector.shape_cast %7 : vector<128xf32> to vector<1x128xf32>
    %9 = arith.addf %6, %8 : vector<1x128xf32>
    %c0_7 = arith.constant 0 : index
    %c0_8 = arith.constant 0 : index
    %10 = vector.load %arg3[%c0_7, %c0_8] : memref<1x128xf32, #tpu.memory_space<vmem>>, vector<1x128xf32>
    tpu.vector_store %arg3[%c0_7, %c0_8], %9 {strides = array<i32>} : memref<1x128xf32, #tpu.memory_space<vmem>>, vector<1x128xf32>,
    %c0_9 = arith.constant 0 : index
    %c0_10 = arith.constant 0 : index
    %11 = vector.load %arg4[%c0_9, %c0_10] : memref<1x128xf32, #tpu.memory_space<vmem>>, vector<1x128xf32>
    %12 = arith.mulf %5, %5 : vector<64x128xf32>
    %cst_11 = arith.constant dense<0.000000e+00> : vector<128xf32>
    %13 = vector.multi_reduction <add>, %12, %cst_11 [0] : vector<64x128xf32> to vector<128xf32>
    %14 = vector.shape_cast %13 : vector<128xf32> to vector<1x128xf32>
    %15 = arith.addf %11, %14 : vector<1x128xf32>
    %c0_12 = arith.constant 0 : index
    %c0_13 = arith.constant 0 : index
    %16 = vector.load %arg4[%c0_12, %c0_13] : memref<1x128xf32, #tpu.memory_space<vmem>>, vector<1x128xf32>
    tpu.vector_store %arg4[%c0_12, %c0_13], %15 {strides = array<i32>} : memref<1x128xf32, #tpu.memory_space<vmem>>, vector<1x128xf32>,
    return
  }
  func.func @transform_0(%arg0: i32) -> (i32, i32) {
    %c0_i32 = arith.constant 0 : i32
    %c0_i32_0 = arith.constant 0 : i32
    return %arg0, %c0_i32 : i32, i32
  }
  func.func @transform_1(%arg0: i32) -> (i32, i32) {
    %c0_i32 = arith.constant 0 : i32
    %c0_i32_0 = arith.constant 0 : i32
    %c0_i32_1 = arith.constant 0 : i32
    return %c0_i32, %c0_i32_0 : i32, i32
  }
  func.func @transform_2(%arg0: i32) -> (i32, i32) {
    %c0_i32 = arith.constant 0 : i32
    %c0_i32_0 = arith.constant 0 : i32
    %c0_i32_1 = arith.constant 0 : i32
    return %c0_i32, %c0_i32_0 : i32, i32
  }
  func.func @transform_3(%arg0: i32) -> (i32, i32) {
    %c0_i32 = arith.constant 0 : i32
    %c0_i32_0 = arith.constant 0 : i32
    %c0_i32_1 = arith.constant 0 : i32
    return %c0_i32, %c0_i32_0 : i32, i32
  }
}

module attributes {stable_mosaic.version = 11 : i64} {
  func.func @_norm_kernel(%arg0: i32, %arg1: memref<64x36xf32, #tpu.memory_space<vmem>>, %arg2: memref<36x128xf32, #tpu.memory_space<vmem>>, %arg3: memref<2x128xf32, #tpu.memory_space<vmem>>, %arg4: memref<64x128xf32, #tpu.memory_space<vmem>>) attributes {dimension_semantics = [#tpu.dimension_semantics<parallel>], iteration_bounds = array<i64: 2>, scalar_prefetch = 0 : i64, scratch_operands = 0 : i64, tpu.core_type = #tpu.core_type<tc>, window_params = [{transform_indices = @transform_0, window_bounds = array<i64: 64, 36>}, {pipeline_mode = #tpu.pipeline_mode<synchronous>, transform_indices = @transform_1, window_bounds = array<i64: 36, 128>}, {pipeline_mode = #tpu.pipeline_mode<synchronous>, transform_indices = @transform_2, window_bounds = array<i64: 2, 128>}, {transform_indices = @transform_3, window_bounds = array<i64: 64, 128>}]} {
    %c0 = arith.constant 0 : index
    %c0_0 = arith.constant 0 : index
    %0 = vector.load %arg1[%c0, %c0_0] : memref<64x36xf32, #tpu.memory_space<vmem>>, vector<64x36xf32>
    %c0_1 = arith.constant 0 : index
    %c0_2 = arith.constant 0 : index
    %1 = vector.load %arg2[%c0_1, %c0_2] : memref<36x128xf32, #tpu.memory_space<vmem>>, vector<36x128xf32>
    %cst = arith.constant dense<0.000000e+00> : vector<64x128xf32>
    %2 = tpu.matmul %0, %1, %cst {dimension_numbers = #tpu.dot_dimension_numbers<[1], [0], [0], [1], [0, 0, 1, 1], [], []>} : vector<64x36xf32>, vector<36x128xf32>, vector<64x128xf32> -> vector<64x128xf32>
    %c0_3 = arith.constant 0 : index
    %c0_4 = arith.constant 0 : index
    %3 = vector.load %arg3[%c0_3, %c0_4] : memref<2x128xf32, #tpu.memory_space<vmem>>, vector<1x128xf32>
    %4 = vector.broadcast %3 : vector<1x128xf32> to vector<64x128xf32>
    %5 = arith.mulf %2, %4 : vector<64x128xf32>
    %c1 = arith.constant 1 : index
    %c0_5 = arith.constant 0 : index
    %6 = vector.load %arg3[%c1, %c0_5] : memref<2x128xf32, #tpu.memory_space<vmem>>, vector<1x128xf32>
    %7 = vector.broadcast %6 : vector<1x128xf32> to vector<64x128xf32>
    %8 = arith.addf %5, %7 : vector<64x128xf32>
    %cst_6 = arith.constant 0.000000e+00 : f32
    %9 = vector.broadcast %cst_6 : f32 to vector<64x128xf32>
    %10 = arith.maximumf %8, %9 : vector<64x128xf32>
    %c0_7 = arith.constant 0 : index
    %c0_8 = arith.constant 0 : index
    %11 = vector.load %arg4[%c0_7, %c0_8] : memref<64x128xf32, #tpu.memory_space<vmem>>, vector<64x128xf32>
    tpu.vector_store %arg4[%c0_7, %c0_8], %10 {strides = array<i32>} : memref<64x128xf32, #tpu.memory_space<vmem>>, vector<64x128xf32>,
    return
  }
  func.func @transform_0(%arg0: i32) -> (i32, i32) {
    %c0_i32 = arith.constant 0 : i32
    %c0_i32_0 = arith.constant 0 : i32
    return %arg0, %c0_i32 : i32, i32
  }
  func.func @transform_1(%arg0: i32) -> (i32, i32) {
    %c0_i32 = arith.constant 0 : i32
    %c0_i32_0 = arith.constant 0 : i32
    %c0_i32_1 = arith.constant 0 : i32
    return %c0_i32, %c0_i32_0 : i32, i32
  }
  func.func @transform_2(%arg0: i32) -> (i32, i32) {
    %c0_i32 = arith.constant 0 : i32
    %c0_i32_0 = arith.constant 0 : i32
    %c0_i32_1 = arith.constant 0 : i32
    return %c0_i32, %c0_i32_0 : i32, i32
  }
  func.func @transform_3(%arg0: i32) -> (i32, i32) {
    %c0_i32 = arith.constant 0 : i32
    %c0_i32_0 = arith.constant 0 : i32
    return %arg0, %c0_i32 : i32, i32
  }
}

module attributes {stable_mosaic.version = 11 : i64} {
  func.func @_stats2_kernel(%arg0: i32, %arg1: memref<64x72xf32, #tpu.memory_space<vmem>>, %arg2: memref<72x128xf32, #tpu.memory_space<vmem>>, %arg3: memref<64x4xf32, #tpu.memory_space<vmem>>, %arg4: memref<4x128xf32, #tpu.memory_space<vmem>>, %arg5: memref<1x128xf32, #tpu.memory_space<vmem>>, %arg6: memref<1x128xf32, #tpu.memory_space<vmem>>, %arg7: memref<1x128xf32, #tpu.memory_space<vmem>>, %arg8: memref<1x128xf32, #tpu.memory_space<vmem>>) attributes {dimension_semantics = [#tpu.dimension_semantics<arbitrary>], iteration_bounds = array<i64: 2>, scalar_prefetch = 0 : i64, scratch_operands = 0 : i64, tpu.core_type = #tpu.core_type<tc>, window_params = [{transform_indices = @transform_0, window_bounds = array<i64: 64, 72>}, {pipeline_mode = #tpu.pipeline_mode<synchronous>, transform_indices = @transform_1, window_bounds = array<i64: 72, 128>}, {transform_indices = @transform_2, window_bounds = array<i64: 64, 4>}, {pipeline_mode = #tpu.pipeline_mode<synchronous>, transform_indices = @transform_3, window_bounds = array<i64: 4, 128>}, {pipeline_mode = #tpu.pipeline_mode<synchronous>, transform_indices = @transform_4, window_bounds = array<i64: 1, 128>}, {pipeline_mode = #tpu.pipeline_mode<synchronous>, transform_indices = @transform_5, window_bounds = array<i64: 1, 128>}, {pipeline_mode = #tpu.pipeline_mode<synchronous>, transform_indices = @transform_6, window_bounds = array<i64: 1, 128>}, {pipeline_mode = #tpu.pipeline_mode<synchronous>, transform_indices = @transform_7, window_bounds = array<i64: 1, 128>}]} {
    %c0_i32 = arith.constant 0 : i32
    %0 = arith.cmpi eq, %arg0, %c0_i32 : i32
    %1 = arith.extui %0 : i1 to i32
    %c0_i32_0 = arith.constant 0 : i32
    %2 = arith.cmpi ne, %1, %c0_i32_0 : i32
    scf.if %2 {
      %cst_29 = arith.constant 0.000000e+00 : f32
      %31 = vector.broadcast %cst_29 : f32 to vector<1x128xf32>
      %c0_30 = arith.constant 0 : index
      %c0_31 = arith.constant 0 : index
      %32 = vector.load %arg5[%c0_30, %c0_31] : memref<1x128xf32, #tpu.memory_space<vmem>>, vector<1x128xf32>
      tpu.vector_store %arg5[%c0_30, %c0_31], %31 {strides = array<i32>} : memref<1x128xf32, #tpu.memory_space<vmem>>, vector<1x128xf32>,
      %cst_32 = arith.constant 0.000000e+00 : f32
      %33 = vector.broadcast %cst_32 : f32 to vector<1x128xf32>
      %c0_33 = arith.constant 0 : index
      %c0_34 = arith.constant 0 : index
      %34 = vector.load %arg6[%c0_33, %c0_34] : memref<1x128xf32, #tpu.memory_space<vmem>>, vector<1x128xf32>
      tpu.vector_store %arg6[%c0_33, %c0_34], %33 {strides = array<i32>} : memref<1x128xf32, #tpu.memory_space<vmem>>, vector<1x128xf32>,
      %cst_35 = arith.constant 0.000000e+00 : f32
      %35 = vector.broadcast %cst_35 : f32 to vector<1x128xf32>
      %c0_36 = arith.constant 0 : index
      %c0_37 = arith.constant 0 : index
      %36 = vector.load %arg7[%c0_36, %c0_37] : memref<1x128xf32, #tpu.memory_space<vmem>>, vector<1x128xf32>
      tpu.vector_store %arg7[%c0_36, %c0_37], %35 {strides = array<i32>} : memref<1x128xf32, #tpu.memory_space<vmem>>, vector<1x128xf32>,
      %cst_38 = arith.constant 0.000000e+00 : f32
      %37 = vector.broadcast %cst_38 : f32 to vector<1x128xf32>
      %c0_39 = arith.constant 0 : index
      %c0_40 = arith.constant 0 : index
      %38 = vector.load %arg8[%c0_39, %c0_40] : memref<1x128xf32, #tpu.memory_space<vmem>>, vector<1x128xf32>
      tpu.vector_store %arg8[%c0_39, %c0_40], %37 {strides = array<i32>} : memref<1x128xf32, #tpu.memory_space<vmem>>, vector<1x128xf32>,
    } else {
    }
    %c0 = arith.constant 0 : index
    %c0_1 = arith.constant 0 : index
    %3 = vector.load %arg1[%c0, %c0_1] : memref<64x72xf32, #tpu.memory_space<vmem>>, vector<64x72xf32>
    %c0_2 = arith.constant 0 : index
    %c0_3 = arith.constant 0 : index
    %4 = vector.load %arg2[%c0_2, %c0_3] : memref<72x128xf32, #tpu.memory_space<vmem>>, vector<72x128xf32>
    %cst = arith.constant dense<0.000000e+00> : vector<64x128xf32>
    %5 = tpu.matmul %3, %4, %cst {dimension_numbers = #tpu.dot_dimension_numbers<[1], [0], [0], [1], [0, 0, 1, 1], [], []>} : vector<64x72xf32>, vector<72x128xf32>, vector<64x128xf32> -> vector<64x128xf32>
    %c0_4 = arith.constant 0 : index
    %c0_5 = arith.constant 0 : index
    %6 = vector.load %arg3[%c0_4, %c0_5] : memref<64x4xf32, #tpu.memory_space<vmem>>, vector<64x4xf32>
    %c0_6 = arith.constant 0 : index
    %c0_7 = arith.constant 0 : index
    %7 = vector.load %arg4[%c0_6, %c0_7] : memref<4x128xf32, #tpu.memory_space<vmem>>, vector<4x128xf32>
    %cst_8 = arith.constant dense<0.000000e+00> : vector<64x128xf32>
    %8 = tpu.matmul %6, %7, %cst_8 {dimension_numbers = #tpu.dot_dimension_numbers<[1], [0], [0], [1], [0, 0, 1, 1], [], []>} : vector<64x4xf32>, vector<4x128xf32>, vector<64x128xf32> -> vector<64x128xf32>
    %c0_9 = arith.constant 0 : index
    %c0_10 = arith.constant 0 : index
    %9 = vector.load %arg5[%c0_9, %c0_10] : memref<1x128xf32, #tpu.memory_space<vmem>>, vector<1x128xf32>
    %cst_11 = arith.constant dense<0.000000e+00> : vector<128xf32>
    %10 = vector.multi_reduction <add>, %5, %cst_11 [0] : vector<64x128xf32> to vector<128xf32>
    %11 = vector.shape_cast %10 : vector<128xf32> to vector<1x128xf32>
    %12 = arith.addf %9, %11 : vector<1x128xf32>
    %c0_12 = arith.constant 0 : index
    %c0_13 = arith.constant 0 : index
    %13 = vector.load %arg5[%c0_12, %c0_13] : memref<1x128xf32, #tpu.memory_space<vmem>>, vector<1x128xf32>
    tpu.vector_store %arg5[%c0_12, %c0_13], %12 {strides = array<i32>} : memref<1x128xf32, #tpu.memory_space<vmem>>, vector<1x128xf32>,
    %c0_14 = arith.constant 0 : index
    %c0_15 = arith.constant 0 : index
    %14 = vector.load %arg6[%c0_14, %c0_15] : memref<1x128xf32, #tpu.memory_space<vmem>>, vector<1x128xf32>
    %15 = arith.mulf %5, %5 : vector<64x128xf32>
    %cst_16 = arith.constant dense<0.000000e+00> : vector<128xf32>
    %16 = vector.multi_reduction <add>, %15, %cst_16 [0] : vector<64x128xf32> to vector<128xf32>
    %17 = vector.shape_cast %16 : vector<128xf32> to vector<1x128xf32>
    %18 = arith.addf %14, %17 : vector<1x128xf32>
    %c0_17 = arith.constant 0 : index
    %c0_18 = arith.constant 0 : index
    %19 = vector.load %arg6[%c0_17, %c0_18] : memref<1x128xf32, #tpu.memory_space<vmem>>, vector<1x128xf32>
    tpu.vector_store %arg6[%c0_17, %c0_18], %18 {strides = array<i32>} : memref<1x128xf32, #tpu.memory_space<vmem>>, vector<1x128xf32>,
    %c0_19 = arith.constant 0 : index
    %c0_20 = arith.constant 0 : index
    %20 = vector.load %arg7[%c0_19, %c0_20] : memref<1x128xf32, #tpu.memory_space<vmem>>, vector<1x128xf32>
    %cst_21 = arith.constant dense<0.000000e+00> : vector<128xf32>
    %21 = vector.multi_reduction <add>, %8, %cst_21 [0] : vector<64x128xf32> to vector<128xf32>
    %22 = vector.shape_cast %21 : vector<128xf32> to vector<1x128xf32>
    %23 = arith.addf %20, %22 : vector<1x128xf32>
    %c0_22 = arith.constant 0 : index
    %c0_23 = arith.constant 0 : index
    %24 = vector.load %arg7[%c0_22, %c0_23] : memref<1x128xf32, #tpu.memory_space<vmem>>, vector<1x128xf32>
    tpu.vector_store %arg7[%c0_22, %c0_23], %23 {strides = array<i32>} : memref<1x128xf32, #tpu.memory_space<vmem>>, vector<1x128xf32>,
    %c0_24 = arith.constant 0 : index
    %c0_25 = arith.constant 0 : index
    %25 = vector.load %arg8[%c0_24, %c0_25] : memref<1x128xf32, #tpu.memory_space<vmem>>, vector<1x128xf32>
    %26 = arith.mulf %8, %8 : vector<64x128xf32>
    %cst_26 = arith.constant dense<0.000000e+00> : vector<128xf32>
    %27 = vector.multi_reduction <add>, %26, %cst_26 [0] : vector<64x128xf32> to vector<128xf32>
    %28 = vector.shape_cast %27 : vector<128xf32> to vector<1x128xf32>
    %29 = arith.addf %25, %28 : vector<1x128xf32>
    %c0_27 = arith.constant 0 : index
    %c0_28 = arith.constant 0 : index
    %30 = vector.load %arg8[%c0_27, %c0_28] : memref<1x128xf32, #tpu.memory_space<vmem>>, vector<1x128xf32>
    tpu.vector_store %arg8[%c0_27, %c0_28], %29 {strides = array<i32>} : memref<1x128xf32, #tpu.memory_space<vmem>>, vector<1x128xf32>,
    return
  }
  func.func @transform_0(%arg0: i32) -> (i32, i32) {
    %c0_i32 = arith.constant 0 : i32
    %c0_i32_0 = arith.constant 0 : i32
    return %arg0, %c0_i32 : i32, i32
  }
  func.func @transform_1(%arg0: i32) -> (i32, i32) {
    %c0_i32 = arith.constant 0 : i32
    %c0_i32_0 = arith.constant 0 : i32
    %c0_i32_1 = arith.constant 0 : i32
    return %c0_i32, %c0_i32_0 : i32, i32
  }
  func.func @transform_2(%arg0: i32) -> (i32, i32) {
    %c0_i32 = arith.constant 0 : i32
    %c0_i32_0 = arith.constant 0 : i32
    return %arg0, %c0_i32 : i32, i32
  }
  func.func @transform_3(%arg0: i32) -> (i32, i32) {
    %c0_i32 = arith.constant 0 : i32
    %c0_i32_0 = arith.constant 0 : i32
    %c0_i32_1 = arith.constant 0 : i32
    return %c0_i32, %c0_i32_0 : i32, i32
  }
  func.func @transform_4(%arg0: i32) -> (i32, i32) {
    %c0_i32 = arith.constant 0 : i32
    %c0_i32_0 = arith.constant 0 : i32
    %c0_i32_1 = arith.constant 0 : i32
    return %c0_i32, %c0_i32_0 : i32, i32
  }
  func.func @transform_5(%arg0: i32) -> (i32, i32) {
    %c0_i32 = arith.constant 0 : i32
    %c0_i32_0 = arith.constant 0 : i32
    %c0_i32_1 = arith.constant 0 : i32
    return %c0_i32, %c0_i32_0 : i32, i32
  }
  func.func @transform_6(%arg0: i32) -> (i32, i32) {
    %c0_i32 = arith.constant 0 : i32
    %c0_i32_0 = arith.constant 0 : i32
    %c0_i32_1 = arith.constant 0 : i32
    return %c0_i32, %c0_i32_0 : i32, i32
  }
  func.func @transform_7(%arg0: i32) -> (i32, i32) {
    %c0_i32 = arith.constant 0 : i32
    %c0_i32_0 = arith.constant 0 : i32
    %c0_i32_1 = arith.constant 0 : i32
    return %c0_i32, %c0_i32_0 : i32, i32
  }
}

module attributes {stable_mosaic.version = 11 : i64} {
  func.func @_norm_res_kernel(%arg0: i32, %arg1: memref<64x72xf32, #tpu.memory_space<vmem>>, %arg2: memref<72x128xf32, #tpu.memory_space<vmem>>, %arg3: memref<2x128xf32, #tpu.memory_space<vmem>>, %arg4: memref<64x4xf32, #tpu.memory_space<vmem>>, %arg5: memref<4x128xf32, #tpu.memory_space<vmem>>, %arg6: memref<2x128xf32, #tpu.memory_space<vmem>>, %arg7: memref<64x128xf32, #tpu.memory_space<vmem>>) attributes {dimension_semantics = [#tpu.dimension_semantics<parallel>], iteration_bounds = array<i64: 2>, scalar_prefetch = 0 : i64, scratch_operands = 0 : i64, tpu.core_type = #tpu.core_type<tc>, window_params = [{transform_indices = @transform_0, window_bounds = array<i64: 64, 72>}, {pipeline_mode = #tpu.pipeline_mode<synchronous>, transform_indices = @transform_1, window_bounds = array<i64: 72, 128>}, {pipeline_mode = #tpu.pipeline_mode<synchronous>, transform_indices = @transform_2, window_bounds = array<i64: 2, 128>}, {transform_indices = @transform_3, window_bounds = array<i64: 64, 4>}, {pipeline_mode = #tpu.pipeline_mode<synchronous>, transform_indices = @transform_4, window_bounds = array<i64: 4, 128>}, {pipeline_mode = #tpu.pipeline_mode<synchronous>, transform_indices = @transform_5, window_bounds = array<i64: 2, 128>}, {transform_indices = @transform_6, window_bounds = array<i64: 64, 128>}]} {
    %c0 = arith.constant 0 : index
    %c0_0 = arith.constant 0 : index
    %0 = vector.load %arg1[%c0, %c0_0] : memref<64x72xf32, #tpu.memory_space<vmem>>, vector<64x72xf32>
    %c0_1 = arith.constant 0 : index
    %c0_2 = arith.constant 0 : index
    %1 = vector.load %arg2[%c0_1, %c0_2] : memref<72x128xf32, #tpu.memory_space<vmem>>, vector<72x128xf32>
    %cst = arith.constant dense<0.000000e+00> : vector<64x128xf32>
    %2 = tpu.matmul %0, %1, %cst {dimension_numbers = #tpu.dot_dimension_numbers<[1], [0], [0], [1], [0, 0, 1, 1], [], []>} : vector<64x72xf32>, vector<72x128xf32>, vector<64x128xf32> -> vector<64x128xf32>
    %c0_3 = arith.constant 0 : index
    %c0_4 = arith.constant 0 : index
    %3 = vector.load %arg4[%c0_3, %c0_4] : memref<64x4xf32, #tpu.memory_space<vmem>>, vector<64x4xf32>
    %c0_5 = arith.constant 0 : index
    %c0_6 = arith.constant 0 : index
    %4 = vector.load %arg5[%c0_5, %c0_6] : memref<4x128xf32, #tpu.memory_space<vmem>>, vector<4x128xf32>
    %cst_7 = arith.constant dense<0.000000e+00> : vector<64x128xf32>
    %5 = tpu.matmul %3, %4, %cst_7 {dimension_numbers = #tpu.dot_dimension_numbers<[1], [0], [0], [1], [0, 0, 1, 1], [], []>} : vector<64x4xf32>, vector<4x128xf32>, vector<64x128xf32> -> vector<64x128xf32>
    %c0_8 = arith.constant 0 : index
    %c0_9 = arith.constant 0 : index
    %6 = vector.load %arg3[%c0_8, %c0_9] : memref<2x128xf32, #tpu.memory_space<vmem>>, vector<1x128xf32>
    %7 = vector.broadcast %6 : vector<1x128xf32> to vector<64x128xf32>
    %8 = arith.mulf %2, %7 : vector<64x128xf32>
    %c1 = arith.constant 1 : index
    %c0_10 = arith.constant 0 : index
    %9 = vector.load %arg3[%c1, %c0_10] : memref<2x128xf32, #tpu.memory_space<vmem>>, vector<1x128xf32>
    %10 = vector.broadcast %9 : vector<1x128xf32> to vector<64x128xf32>
    %11 = arith.addf %8, %10 : vector<64x128xf32>
    %c0_11 = arith.constant 0 : index
    %c0_12 = arith.constant 0 : index
    %12 = vector.load %arg6[%c0_11, %c0_12] : memref<2x128xf32, #tpu.memory_space<vmem>>, vector<1x128xf32>
    %13 = vector.broadcast %12 : vector<1x128xf32> to vector<64x128xf32>
    %14 = arith.mulf %5, %13 : vector<64x128xf32>
    %c1_13 = arith.constant 1 : index
    %c0_14 = arith.constant 0 : index
    %15 = vector.load %arg6[%c1_13, %c0_14] : memref<2x128xf32, #tpu.memory_space<vmem>>, vector<1x128xf32>
    %16 = vector.broadcast %15 : vector<1x128xf32> to vector<64x128xf32>
    %17 = arith.addf %14, %16 : vector<64x128xf32>
    %18 = arith.addf %11, %17 : vector<64x128xf32>
    %cst_15 = arith.constant 0.000000e+00 : f32
    %19 = vector.broadcast %cst_15 : f32 to vector<64x128xf32>
    %20 = arith.maximumf %18, %19 : vector<64x128xf32>
    %c0_16 = arith.constant 0 : index
    %c0_17 = arith.constant 0 : index
    %21 = vector.load %arg7[%c0_16, %c0_17] : memref<64x128xf32, #tpu.memory_space<vmem>>, vector<64x128xf32>
    tpu.vector_store %arg7[%c0_16, %c0_17], %20 {strides = array<i32>} : memref<64x128xf32, #tpu.memory_space<vmem>>, vector<64x128xf32>,
    return
  }
  func.func @transform_0(%arg0: i32) -> (i32, i32) {
    %c0_i32 = arith.constant 0 : i32
    %c0_i32_0 = arith.constant 0 : i32
    return %arg0, %c0_i32 : i32, i32
  }
  func.func @transform_1(%arg0: i32) -> (i32, i32) {
    %c0_i32 = arith.constant 0 : i32
    %c0_i32_0 = arith.constant 0 : i32
    %c0_i32_1 = arith.constant 0 : i32
    return %c0_i32, %c0_i32_0 : i32, i32
  }
  func.func @transform_2(%arg0: i32) -> (i32, i32) {
    %c0_i32 = arith.constant 0 : i32
    %c0_i32_0 = arith.constant 0 : i32
    %c0_i32_1 = arith.constant 0 : i32
    return %c0_i32, %c0_i32_0 : i32, i32
  }
  func.func @transform_3(%arg0: i32) -> (i32, i32) {
    %c0_i32 = arith.constant 0 : i32
    %c0_i32_0 = arith.constant 0 : i32
    return %arg0, %c0_i32 : i32, i32
  }
  func.func @transform_4(%arg0: i32) -> (i32, i32) {
    %c0_i32 = arith.constant 0 : i32
    %c0_i32_0 = arith.constant 0 : i32
    %c0_i32_1 = arith.constant 0 : i32
    return %c0_i32, %c0_i32_0 : i32, i32
  }
  func.func @transform_5(%arg0: i32) -> (i32, i32) {
    %c0_i32 = arith.constant 0 : i32
    %c0_i32_0 = arith.constant 0 : i32
    %c0_i32_1 = arith.constant 0 : i32
    return %c0_i32, %c0_i32_0 : i32, i32
  }
  func.func @transform_6(%arg0: i32) -> (i32, i32) {
    %c0_i32 = arith.constant 0 : i32
    %c0_i32_0 = arith.constant 0 : i32
    return %arg0, %c0_i32 : i32, i32
  }
}

</mosaic_0001>

<bundles_post_ra>
// kernel: basic_block2_forward.4
= control target key start
LH: loop header
LB: loop body
LE: loop exit
PB: predicated region body
PF: predicated region fallthrough
CT: control target
= control target key end

     0   :  { %s488_s12 = smov 0   ;;  %s553_s0 = inlined_call_operand.vmem [shape: f32[128,36], index: 0, kind: input, shape index: {}]   ;;  %s554_s1 = inlined_call_operand.vmem [shape: f32[36,128], index: 1, kind: input, shape index: {}]   ;;  %s555_s2 = inlined_call_operand.vmem [shape: f32[1,128], index: 2, kind: output, shape index: {0}]   ;;  %s556_s3 = inlined_call_operand.vmem [shape: f32[1,128], index: 3, kind: output, shape index: {1}]  }
   0x1 LB: > { %s383_s13 = sadd.s32 4294967295, %s465_s12   ;;  %p386_p0 = scmp.ge.s32.totalorder %s465_s12, 1  ;;  %s465_s12 = sphi %s488_s12, %s14_s12  }
   0x2   : > { %p131_p1 = scmp.lt.s32.totalorder %s465_s12, 3 }
   0x4   : > { %p132_p2 = pnand %p386_p0, %p131_p1 }
   0x5   : > { %s387_s14 = sshll.u32 (!%p132_p2), %s383_s13, 3  ;;  %p389_p4 = scmp.ne.s32.totalorder (!%p132_p2), %s383_s13, 0 }
   0x6   : > { %135 = sbr.rel (%p132_p2) target bundleno = 279 (0x117), region = 28  ;;  %p151_p3 = scmp.lt.s32.totalorder (!%p132_p2), %s387_s14, 15 }
   0xd   : > { %s558_s14 = smov (!%p151_p3, %s387_s14), 15  ;;  %159 = sbr.rel (%p389_p4) target bundleno = 20 (0x14), region = 32 }
   0xe   : > { %s388_s15 = sshll.u32 %s558_s14, 3  ;;  %v467_v0 = vmov (!%p389_p4), 0.0  }
   0xf   : > { %s499_s18 = scalar_lea.vmem %s553_s0, %s388_s15  ;;  %160 = vst [vmem:[%s555_s2] sm:$0x1] (!%p389_p4), %v467_v0  ;;  %161 = vst [vmem:[%s556_s3] sm:$0x1] (!%p389_p4), %v467_v0 }
  0x14 PF: > { %v170_v1 = vld [vmem:[%s554_s1] sm:$0xff]  ;;  %v171_v2 = vld [vmem:[%s554_s1 + $0x8] sm:$0xff]  ;;  %v172_v3 = vld [vmem:[%s554_s1 + $0x10] sm:$0xff]  ;;  %vm175_vm0 = vcmask 293888   ;;  %vm200_vm1 = vcmask 1043456  }
  0x15   : > { %v436_v4 = vpack.c.bf16 %v171_v2, %v170_v1  ;;  %v173_v5 = vld [vmem:[%s554_s1 + $0x18] sm:$0xff]  ;;  %v162_v6 = vld [vmem:[%s499_s18] sm:$0xff]  ;;  %v163_v10 = vld [vmem:[%s499_s18 + $0x8] sm:$0xff] }
  0x16   : > { %v440_v7 = vpack.c.bf16 %v173_v5, %v172_v3  ;;  %424 = vmatprep.mubr.msk.f32.mxu0 %vm175_vm0, %v162_v6  ;;  %v166_v8 = vld [vmem:[%s499_s18 + $0x20] sm:$0xff]  ;;  %v167_v11 = vld [vmem:[%s499_s18 + $0x28] sm:$0xff]  ;;  %v164_v12 = vld [vmem:[%s499_s18 + $0x10] sm:$0xff] }
  0x17   : > { %437 = vmatprep.subr.bf16.mxu0 %v436_v4  ;;  %444 = vmatprep.subr.bf16.mxu1 %v436_v4  ;;  %v174_v9 = vld [vmem:[%s554_s1 + $0x20] sm:$0xf]  ;;  %v168_v13 = vld [vmem:[%s499_s18 + $0x30] sm:$0xff]  ;;  %v165_v14 = vld [vmem:[%s499_s18 + $0x18] sm:$0xff] }
  0x18   : > { %439 = vmatpush3.bf16.msra.mxu0 %v436_v4  ;;  %447 = vmatpush3.bf16.msra.mxu1 %v436_v4  ;;  %v169_v15 = vld [vmem:[%s499_s18 + $0x38] sm:$0xff]  ;;  %v309_v55 = vld [vmem:[%s555_s2] sm:$0x1] }
  0x19   : > { %441 = vmatprep.subr.bf16.mxu0 %v440_v7  ;;  %445 = vmatprep.subr.bf16.mxu1 %v440_v7  ;;  %v325_v58 = vld [vmem:[%s556_s3] sm:$0x1] }
  0x1a   : > { %430 = vmatprep.mubr.msk.f32.mxu1 %vm175_vm0, %v166_v8 }
  0x1c   : > { %443 = vmatpush3.bf16.msra.mxu0 %v440_v7  ;;  %448 = vmatpush3.bf16.msra.mxu1 %v440_v7 }
  0x1d   : > { %422 = vmatprep.subr.msk.mxu0 %vm200_vm1, %v174_v9  ;;  %446 = vmatprep.subr.msk.mxu1 %vm200_vm1, %v174_v9 }
  0x20   : > { %423 = vmatpush3.msk.msra.mxu0 %vm200_vm1, %v174_v9  ;;  %449 = vmatpush3.msk.msra.mxu1 %vm200_vm1, %v174_v9 }
  0x21   : > { %425 = vmatmul.mubr.msk.f32.vlgmr.msra.gmra.mrb[0].mxu0 %vm175_vm0, %v163_v10  ;;  %431 = vmatmul.mubr.msk.f32.vlgmr.msra.gmra.mrb[0].mxu1 %vm175_vm0, %v167_v11 }
  0x22   : > { %427 = vmatprep.mubr.msk.f32.mxu0 %vm175_vm0, %v164_v12  ;;  %433 = vmatprep.mubr.msk.f32.mxu1 %vm175_vm0, %v168_v13 }
  0x25   : > { %428 = vmatmul.mubr.msk.f32.gmra.mrb[2].mxu0 %vm175_vm0, %v165_v14  ;;  %434 = vmatmul.mubr.msk.f32.gmra.mrb[2].mxu1 %vm175_vm0, %v169_v15 }
  0xf4   : > { %v426_v16 = vpop.f32.mrb[0].mxu0  ;;  %v432_v17 = vpop.f32.mrb[0].mxu1 }
  0xf5   : > { %v327_v18 = vmul.f32 %v426_v16, %v426_v16  ;;  %v270_v19 = vpop.f32.mrb[1].mxu0  ;;  %v290_v20 = vpop.f32.mrb[1].mxu1  ;;  %v331_v36 = vmul.f32 %v432_v17, %v432_v17 }
  0xf6   : > { %v310_v21 = vadd.f32 %v426_v16, %v270_v19  ;;  %v326_v22 = vmul.f32 %v270_v19, %v270_v19  ;;  %v330_v33 = vmul.f32 %v290_v20, %v290_v20 }
  0xf8   : > { %v334_v23 = vadd.f32 %v327_v18, %v326_v22  ;;  %v429_v24 = vpop.f32.mrb[2].mxu0  ;;  %v435_v25 = vpop.f32.mrb[2].mxu1 }
  0xf9   : > { %v280_v26 = vpop.f32.mrb[3].mxu0  ;;  %v300_v27 = vpop.f32.mrb[3].mxu1  ;;  %v329_v30 = vmul.f32 %v429_v24, %v429_v24  ;;  %v333_v42 = vmul.f32 %v435_v25, %v435_v25 }
  0xfa   : > { %v311_v28 = vadd.f32 %v310_v21, %v280_v26  ;;  %v328_v29 = vmul.f32 %v280_v26, %v280_v26  ;;  %v332_v39 = vmul.f32 %v300_v27, %v300_v27 }
  0xfc   : > { %v312_v31 = vadd.f32 %v429_v24, %v311_v28  ;;  %v335_v32 = vadd.f32 %v334_v23, %v328_v29 }
  0xfe   : > { %v336_v34 = vadd.f32 %v335_v32, %v329_v30  ;;  %v313_v35 = vadd.f32 %v312_v31, %v290_v20 }
 0x100   : > { %v337_v37 = vadd.f32 %v336_v34, %v330_v33  ;;  %v314_v38 = vadd.f32 %v432_v17, %v313_v35 }
 0x102   : > { %v315_v40 = vadd.f32 %v314_v38, %v300_v27  ;;  %v338_v41 = vadd.f32 %v337_v37, %v331_v36 }
 0x104   : > { %v316_v43 = vadd.f32 %v435_v25, %v315_v40  ;;  %v339_v44 = vadd.f32 %v338_v41, %v332_v39 }
 0x106   : > { %v317_v45 = vrot.slane %v316_v43, 4  ;;  %v340_v46 = vadd.f32 %v339_v44, %v333_v42 }
 0x108   : > { %v318_v47 = vadd.f32 %v317_v45, %v316_v43  ;;  %v341_v48 = vrot.slane %v340_v46, 4 }
 0x10a   : > { %v319_v49 = vrot.slane %v318_v47, 2  ;;  %v342_v50 = vadd.f32 %v341_v48, %v340_v46 }
 0x10c   : > { %v320_v51 = vadd.f32 %v319_v49, %v318_v47  ;;  %v343_v52 = vrot.slane %v342_v50, 2 }
 0x10e   : > { %v321_v53 = vrot.slane %v320_v51, 1  ;;  %v344_v54 = vadd.f32 %v343_v52, %v342_v50 }
 0x110   : > { %v322_v56 = vadd.f32 %v321_v53, %v320_v51  ;;  %v345_v57 = vrot.slane %v344_v54, 1 }
 0x112   : > { %v323_v59 = vadd.f32 %v322_v56, %v309_v55  ;;  %v346_v60 = vadd.f32 %v345_v57, %v344_v54 }
 0x114   : > { %324 = vst [vmem:[%s555_s2] sm:$0x1] %v323_v59  ;;  %v347_v61 = vadd.f32 %v346_v60, %v325_v58 }
 0x116   : > { %348 = vst [vmem:[%s556_s3] sm:$0x1] %v347_v61 }
 0x117 PF: > { %s14_s12 = sadd.s32 1, %s465_s12  }
 0x118   : > { %p11_p5 = scmp.ge.s32.totalorder %s14_s12, 4  }
 0x11a   :  { %13 = sbr.rel (!%p11_p5) target bundleno = 1 (0x1), region = 66 }

// kernel: basic_block2_forward.5
= control target key start
LH: loop header
LB: loop body
LE: loop exit
PB: predicated region body
PF: predicated region fallthrough
CT: control target
= control target key end

     0   :  { %s526_s12 = smov 0   ;;  %s583_s0 = inlined_call_operand.vmem [shape: f32[128,36], index: 0, kind: input, shape index: {}]   ;;  %s584_s1 = inlined_call_operand.vmem [shape: f32[36,128], index: 1, kind: input, shape index: {}]   ;;  %s585_s2 = inlined_call_operand.vmem [shape: f32[2,128], index: 2, kind: input, shape index: {}]   ;;  %s586_s3 = inlined_call_operand.vmem [shape: f32[128,128], index: 3, kind: output, shape index: {}]  }
   0x1 LB: > { %s419_s13 = sadd.s32 4294967295, %s504_s12   ;;  %p423_p0 = scmp.ge.s32.totalorder %s504_s12, 1  ;;  %s504_s12 = sphi %s526_s12, %s13_s12  }
   0x2   : > { %p138_p1 = scmp.lt.s32.totalorder %s504_s12, 3 }
   0x4   : > { %p139_p2 = pnand %p423_p0, %p138_p1 }
   0x5   : > { %v182_v0 = vld [vmem:[%s584_s1] sm:$0xff] (!%p139_p2)  ;;  %v183_v1 = vld [vmem:[%s584_s1 + $0x8] sm:$0xff] (!%p139_p2)  ;;  %v184_v2 = vld [vmem:[%s584_s1 + $0x10] sm:$0xff] (!%p139_p2)  ;;  %s424_s20 = sshll.u32 (!%p139_p2), %s419_s13, 3  ;;  %vm212_vm0 = vcmask (!%p139_p2), 1043456   ;;  %vm187_vm1 = vcmask (!%p139_p2), 293888  }
   0x6   : > { %142 = sbr.rel (%p139_p2) target bundleno = 243 (0xf3), region = 32  ;;  %v476_v3 = vpack.c.bf16 (!%p139_p2), %v183_v1, %v182_v0  ;;  %v185_v4 = vld [vmem:[%s584_s1 + $0x18] sm:$0xff] (!%p139_p2)  ;;  %p163_p3 = scmp.lt.s32.totalorder (!%p139_p2), %s424_s20, 15  ;;  %v186_v6 = vld [vmem:[%s584_s1 + $0x20] sm:$0xf] (!%p139_p2) }
   0x7   : > { %v480_v5 = vpack.c.bf16 (!%p139_p2), %v185_v4, %v184_v2  ;;  %v437_v15 = vld [vmem:[%s585_s2] ss:$0 sm:$0xff] (!%p139_p2)  ;;  %v438_v17 = vld [vmem:[%s585_s2 + $0x1] ss:$0 sm:$0xff] (!%p139_p2) }
   0x8   : > { %477 = vmatprep.subr.bf16.mxu0 (!%p139_p2), %v476_v3  ;;  %484 = vmatprep.subr.bf16.mxu1 (!%p139_p2), %v476_v3 }
   0x9   : > { %479 = vmatpush3.bf16.msra.mxu0 (!%p139_p2), %v476_v3  ;;  %487 = vmatpush3.bf16.msra.mxu1 (!%p139_p2), %v476_v3 }
   0xa   : > { %481 = vmatprep.subr.bf16.mxu0 (!%p139_p2), %v480_v5  ;;  %485 = vmatprep.subr.bf16.mxu1 (!%p139_p2), %v480_v5 }
   0xd   : > { %s588_s20 = smov (!%p163_p3, %s424_s20), 15  ;;  %483 = vmatpush3.bf16.msra.mxu0 %v480_v5  ;;  %488 = vmatpush3.bf16.msra.mxu1 %v480_v5 }
   0xe   : > { %s425_s23 = sshll.u32 %s588_s20, 3  ;;  %462 = vmatprep.subr.msk.mxu0 %vm212_vm0, %v186_v6  ;;  %486 = vmatprep.subr.msk.mxu1 %vm212_vm0, %v186_v6 }
   0xf   : > { %s166_s28 = scalar_lea.vmem %s583_s0, %s425_s23  ;;  %s172_s8 = scalar_lea.vmem %s586_s3, %s425_s23 }
  0x10   : > { %v174_v7 = vld [vmem:[%s166_s28] sm:$0xff]  ;;  %v175_v9 = vld [vmem:[%s166_s28 + $0x8] sm:$0xff]  ;;  %v176_v11 = vld [vmem:[%s166_s28 + $0x10] sm:$0xff] }
  0x11   : > { %v178_v8 = vld [vmem:[%s166_s28 + $0x20] sm:$0xff]  ;;  %464 = vmatprep.mubr.msk.f32.mxu0 %vm187_vm1, %v174_v7  ;;  %v179_v10 = vld [vmem:[%s166_s28 + $0x28] sm:$0xff]  ;;  %v180_v12 = vld [vmem:[%s166_s28 + $0x30] sm:$0xff]  ;;  %463 = vmatpush3.msk.msra.mxu0 %vm212_vm0, %v186_v6 }
  0x12   : > { %470 = vmatprep.mubr.msk.f32.mxu1 %vm187_vm1, %v178_v8  ;;  %489 = vmatpush3.msk.msra.mxu1 %vm212_vm0, %v186_v6  ;;  %v177_v13 = vld [vmem:[%s166_s28 + $0x18] sm:$0xff] }
  0x13   : > { %465 = vmatmul.mubr.msk.f32.vlgmr.msra.gmra.mrb[0].mxu0 %vm187_vm1, %v175_v9  ;;  %471 = vmatmul.mubr.msk.f32.vlgmr.msra.gmra.mrb[0].mxu1 %vm187_vm1, %v179_v10  ;;  %v181_v14 = vld [vmem:[%s166_s28 + $0x38] sm:$0xff] }
  0x14   : > { %467 = vmatprep.mubr.msk.f32.mxu0 %vm187_vm1, %v176_v11  ;;  %473 = vmatprep.mubr.msk.f32.mxu1 %vm187_vm1, %v180_v12 }
  0x17   : > { %468 = vmatmul.mubr.msk.f32.gmra.mrb[2].mxu0 %vm187_vm1, %v177_v13  ;;  %474 = vmatmul.mubr.msk.f32.gmra.mrb[2].mxu1 %vm187_vm1, %v181_v14 }
  0xe6   : > { %v466_v16 = vpop.f32.mrb[0].mxu0  ;;  %v472_v18 = vpop.f32.mrb[0].mxu1 }
  0xe7   : > { %v327_v19 = vmul.f32 %v466_v16, %v437_v15  ;;  %v331_v20 = vmul.f32 %v472_v18, %v437_v15  ;;  %v282_v21 = vpop.f32.mrb[1].mxu0  ;;  %v302_v22 = vpop.f32.mrb[1].mxu1 }
  0xe8   : > { %v326_v23 = vmul.f32 %v437_v15, %v282_v21  ;;  %v330_v24 = vmul.f32 %v437_v15, %v302_v22 }
  0xe9   : > { %v340_v25 = vadd.f32 %v438_v17, %v327_v19  ;;  %v344_v26 = vadd.f32 %v438_v17, %v331_v20 }
  0xea   : > { %v339_v27 = vadd.f32 %v438_v17, %v326_v23  ;;  %v343_v28 = vadd.f32 %v438_v17, %v330_v24  ;;  %v469_v29 = vpop.f32.mrb[2].mxu0  ;;  %v475_v30 = vpop.f32.mrb[2].mxu1 }
  0xeb   : > { %v348_v31 = vmax.f32 %v340_v25, 0.0  ;;  %v352_v32 = vmax.f32 %v344_v26, 0.0  ;;  %v329_v33 = vmul.f32 %v469_v29, %v437_v15  ;;  %v333_v34 = vmul.f32 %v475_v30, %v437_v15  ;;  %v292_v35 = vpop.f32.mrb[3].mxu0  ;;  %v312_v36 = vpop.f32.mrb[3].mxu1 }
  0xec   : > { %v347_v37 = vmax.f32 %v339_v27, 0.0  ;;  %v351_v38 = vmax.f32 %v343_v28, 0.0  ;;  %v328_v39 = vmul.f32 %v437_v15, %v292_v35  ;;  %v332_v40 = vmul.f32 %v437_v15, %v312_v36 }
  0xed   : > { %356 = vst [vmem:[%s172_s8 + $0x8] sm:$0xff] %v348_v31  ;;  %360 = vst [vmem:[%s172_s8 + $0x28] sm:$0xff] %v352_v32  ;;  %v342_v41 = vadd.f32 %v438_v17, %v329_v33  ;;  %v346_v42 = vadd.f32 %v438_v17, %v333_v34 }
  0xee   : > { %355 = vst [vmem:[%s172_s8] sm:$0xff] %v347_v37  ;;  %359 = vst [vmem:[%s172_s8 + $0x20] sm:$0xff] %v351_v38  ;;  %v341_v43 = vadd.f32 %v438_v17, %v328_v39  ;;  %v345_v44 = vadd.f32 %v438_v17, %v332_v40 }
  0xef   : > { %v350_v45 = vmax.f32 %v342_v41, 0.0  ;;  %v354_v46 = vmax.f32 %v346_v42, 0.0 }
  0xf0   : > { %v349_v47 = vmax.f32 %v341_v43, 0.0  ;;  %v353_v48 = vmax.f32 %v345_v44, 0.0 }
  0xf1   : > { %358 = vst [vmem:[%s172_s8 + $0x18] sm:$0xff] %v350_v45  ;;  %362 = vst [vmem:[%s172_s8 + $0x38] sm:$0xff] %v354_v46 }
  0xf2   : > { %357 = vst [vmem:[%s172_s8 + $0x10] sm:$0xff] %v349_v47  ;;  %361 = vst [vmem:[%s172_s8 + $0x30] sm:$0xff] %v353_v48 }
  0xf3 PF: > { %s13_s12 = sadd.s32 1, %s504_s12  }
  0xf4   : > { %p10_p4 = scmp.ge.s32.totalorder %s13_s12, 4  }
  0xf6   :  { %12 = sbr.rel (!%p10_p4) target bundleno = 1 (0x1), region = 62 }

// kernel: basic_block2_forward.7
= control target key start
LH: loop header
LB: loop body
LE: loop exit
PB: predicated region body
PF: predicated region fallthrough
CT: control target
= control target key end

     0   :  { %s882_s21 = smov 0   ;;  %s985_s0 = inlined_call_operand.vmem [shape: f32[128,72], index: 0, kind: input, shape index: {}]   ;;  %s986_s1 = inlined_call_operand.vmem [shape: f32[72,128], index: 1, kind: input, shape index: {}]   ;;  %s987_s2 = inlined_call_operand.vmem [shape: f32[2,128], index: 2, kind: input, shape index: {}]   ;;  %s988_s3 = inlined_call_operand.vmem [shape: f32[128,4], index: 3, kind: input, shape index: {}]   ;;  %s989_s4 = inlined_call_operand.vmem [shape: f32[4,128], index: 4, kind: input, shape index: {}]   ;;  %s990_s5 = inlined_call_operand.vmem [shape: f32[2,128], index: 5, kind: input, shape index: {}]   ;;  %s991_s6 = inlined_call_operand.vmem [shape: f32[128,128], index: 6, kind: output, shape index: {}]  }
   0x1 LB: > { %s711_s22 = sadd.s32 4294967295, %s845_s21   ;;  %p715_p0 = scmp.ge.s32.totalorder %s845_s21, 1  ;;  %s845_s21 = sphi %s882_s21, %s16_s21  }
   0x2   : > { %p224_p1 = scmp.lt.s32.totalorder %s845_s21, 3 }
   0x4   : > { %p225_p2 = pnand %p715_p0, %p224_p1 }
   0x5   : > { %v285_v0 = vld [vmem:[%s986_s1] sm:$0xff] (!%p225_p2)  ;;  %v286_v1 = vld [vmem:[%s986_s1 + $0x8] sm:$0xff] (!%p225_p2)  ;;  %v287_v2 = vld [vmem:[%s986_s1 + $0x10] sm:$0xff] (!%p225_p2)  ;;  %vm458_vm0 = vcmask (!%p225_p2), 1043456   ;;  %s716_s29 = sshll.u32 (!%p225_p2), %s711_s22, 3  ;;  %vm433_vm1 = vcmask (!%p225_p2), 31744  }
   0x6   : > { %228 = sbr.rel (%p225_p2) target bundleno = 260 (0x104), region = 44  ;;  %v815_v3 = vpack.c.bf16 (!%p225_p2), %v286_v1, %v285_v0  ;;  %v288_v4 = vld [vmem:[%s986_s1 + $0x18] sm:$0xff] (!%p225_p2)  ;;  %p260_p3 = scmp.lt.s32.totalorder (!%p225_p2), %s716_s29, 15  ;;  %v289_v6 = vld [vmem:[%s986_s1 + $0x20] sm:$0xff] (!%p225_p2)  ;;  %v290_v7 = vld [vmem:[%s986_s1 + $0x28] sm:$0xff] (!%p225_p2)  ;;  %vm294_vm2 = vcmask (!%p225_p2), 588800  }
   0x7   : > { %v819_v5 = vpack.c.bf16 (!%p225_p2), %v288_v4, %v287_v2  ;;  %v432_v8 = vld [vmem:[%s989_s4] sm:$0xf] (!%p225_p2)  ;;  %v823_v9 = vpack.c.bf16 (!%p225_p2), %v290_v7, %v289_v6  ;;  %v291_v10 = vld [vmem:[%s986_s1 + $0x30] sm:$0xff] (!%p225_p2)  ;;  %v292_v11 = vld [vmem:[%s986_s1 + $0x38] sm:$0xff] (!%p225_p2) }
   0x8   : > { %816 = vmatprep.subr.bf16.mxu0 (!%p225_p2), %v815_v3  ;;  %801 = vmatprep.subr.msk.mxu1 (!%p225_p2), %vm458_vm0, %v432_v8  ;;  %v827_v16 = vpack.c.bf16 (!%p225_p2), %v292_v11, %v291_v10  ;;  %v293_v19 = vld [vmem:[%s986_s1 + $0x40] sm:$0xff] (!%p225_p2) }
   0x9   : > { %818 = vmatpush3.bf16.msra.mxu0 (!%p225_p2), %v815_v3  ;;  %802 = vmatpush3.msk.msra.mxu1 (!%p225_p2), %vm458_vm0, %v432_v8  ;;  %v741_v33 = vld [vmem:[%s990_s5] ss:$0 sm:$0xff] (!%p225_p2)  ;;  %v742_v37 = vld [vmem:[%s990_s5 + $0x1] ss:$0 sm:$0xff] (!%p225_p2) }
   0xa   : > { %820 = vmatprep.subr.bf16.mxu0 (!%p225_p2), %v819_v5  ;;  %v739_v38 = vld [vmem:[%s987_s2] ss:$0 sm:$0xff] (!%p225_p2)  ;;  %v740_v42 = vld [vmem:[%s987_s2 + $0x1] ss:$0 sm:$0xff] (!%p225_p2) }
   0xd   : > { %s993_s29 = smov (!%p260_p3, %s716_s29), 15  ;;  %822 = vmatpush3.bf16.msra.mxu0 %v819_v5 }
   0xe   : > { %s911_s14 = sshll.u32 %s993_s29, 3  ;;  %824 = vmatprep.subr.bf16.mxu0 %v823_v9 }
   0xf   : > { %s269_s22 = scalar_lea.vmem %s988_s3, %s911_s14  ;;  %s927_s25 = scalar_lea.vmem %s985_s0, %s911_s14 }
  0x10   : > { %v424_v12 = vld [vmem:[%s269_s22] sm:$0xff]  ;;  %v425_v13 = vld [vmem:[%s269_s22 + $0x8] sm:$0xff]  ;;  %v426_v15 = vld [vmem:[%s269_s22 + $0x10] sm:$0xff]  ;;  %s972_s15 = scalar_lea.vmem %s991_s6, %s911_s14 }
  0x11   : > { %803 = vmatprep.mubr.msk.f32.mxu1 %vm433_vm1, %v424_v12  ;;  %v277_v14 = vld [vmem:[%s927_s25] sm:$0xff]  ;;  %v427_v17 = vld [vmem:[%s269_s22 + $0x18] sm:$0xff]  ;;  %826 = vmatpush3.bf16.msra.mxu0 %v823_v9  ;;  %v429_v20 = vld [vmem:[%s269_s22 + $0x28] sm:$0xff] }
  0x12   : > { %789 = vmatprep.mubr.msk.f32.mxu0 %vm294_vm2, %v277_v14  ;;  %804 = vmatmul.mubr.msk.f32.vlgmr.msra.gmra.mrb[0].mxu1 %vm433_vm1, %v425_v13  ;;  %v428_v18 = vld [vmem:[%s269_s22 + $0x20] sm:$0xff]  ;;  %v430_v21 = vld [vmem:[%s269_s22 + $0x30] sm:$0xff]  ;;  %v278_v22 = vld [vmem:[%s927_s25 + $0x8] sm:$0xff] }
  0x13   : > { %806 = vmatprep.mubr.msk.f32.mxu1 %vm433_vm1, %v426_v15  ;;  %828 = vmatprep.subr.bf16.mxu0 %v827_v16  ;;  %v279_v23 = vld [vmem:[%s927_s25 + $0x10] sm:$0xff]  ;;  %v431_v24 = vld [vmem:[%s269_s22 + $0x38] sm:$0xff]  ;;  %v281_v26 = vld [vmem:[%s927_s25 + $0x20] sm:$0xff] }
  0x14   : > { %v280_v25 = vld [vmem:[%s927_s25 + $0x18] sm:$0xff]  ;;  %v282_v27 = vld [vmem:[%s927_s25 + $0x28] sm:$0xff]  ;;  %v283_v28 = vld [vmem:[%s927_s25 + $0x30] sm:$0xff] }
  0x15   : > { %830 = vmatpush3.bf16.msra.mxu0 %v827_v16  ;;  %v284_v29 = vld [vmem:[%s927_s25 + $0x38] sm:$0xff] }
  0x16   : > { %807 = vmatmul.mubr.msk.f32.gmra.mrb[2].mxu1 %vm433_vm1, %v427_v17  ;;  %787 = vmatprep.subr.mxu0 %v293_v19 }
  0x17   : > { %809 = vmatprep.mubr.msk.f32.mxu1 %vm433_vm1, %v428_v18 }
  0x19   : > { %788 = vmatpush3.msra.mxu0 %v293_v19 }
  0x1a   : > { %810 = vmatmul.mubr.msk.f32.gmra.mrb[4].mxu1 %vm433_vm1, %v429_v20  ;;  %790 = vmatmul.mubr.msk.f32.vlgmr.msra.gmra.mrb[0].mxu0 %vm294_vm2, %v278_v22 }
  0x1b   : > { %812 = vmatprep.mubr.msk.f32.mxu1 %vm433_vm1, %v430_v21  ;;  %792 = vmatprep.mubr.msk.f32.mxu0 %vm294_vm2, %v279_v23 }
  0x1e   : > { %813 = vmatmul.mubr.msk.f32.gmra.mrb[6].mxu1 %vm433_vm1, %v431_v24  ;;  %793 = vmatmul.mubr.msk.f32.gmra.mrb[2].mxu0 %vm294_vm2, %v280_v25 }
  0x1f   : > { %795 = vmatprep.mubr.msk.f32.mxu0 %vm294_vm2, %v281_v26 }
  0x22   : > { %796 = vmatmul.mubr.msk.f32.gmra.mrb[4].mxu0 %vm294_vm2, %v282_v27 }
  0x23   : > { %798 = vmatprep.mubr.msk.f32.mxu0 %vm294_vm2, %v283_v28 }
  0x26   : > { %799 = vmatmul.mubr.msk.f32.gmra.mrb[6].mxu0 %vm294_vm2, %v284_v29 }
  0xe5   : > { %v805_v30 = vpop.f32.mrb[0].mxu1 }
  0xe6   : > { %v528_v31 = vpop.f32.mrb[1].mxu1  ;;  %v599_v35 = vmul.f32 %v805_v30, %v741_v33 }
  0xe7   : > { %v598_v39 = vmul.f32 %v741_v33, %v528_v31 }
  0xe8   : > { %v612_v43 = vadd.f32 %v742_v37, %v599_v35 }
  0xe9   : > { %v808_v32 = vpop.f32.mrb[2].mxu1  ;;  %v611_v48 = vadd.f32 %v742_v37, %v598_v39 }
  0xea   : > { %v538_v34 = vpop.f32.mrb[3].mxu1  ;;  %v601_v46 = vmul.f32 %v808_v32, %v741_v33 }
  0xeb   : > { %v600_v50 = vmul.f32 %v741_v33, %v538_v34 }
  0xec   : > { %v614_v56 = vadd.f32 %v742_v37, %v601_v46 }
  0xed   : > { %v811_v36 = vpop.f32.mrb[4].mxu1  ;;  %v791_v41 = vpop.f32.mrb[0].mxu0  ;;  %v613_v61 = vadd.f32 %v742_v37, %v600_v50 }
  0xee   : > { %v548_v40 = vpop.f32.mrb[5].mxu1  ;;  %v573_v44 = vmul.f32 %v791_v41, %v739_v38  ;;  %v385_v45 = vpop.f32.mrb[1].mxu0  ;;  %v603_v59 = vmul.f32 %v811_v36, %v741_v33 }
  0xef   : > { %v572_v49 = vmul.f32 %v739_v38, %v385_v45  ;;  %v602_v63 = vmul.f32 %v741_v33, %v548_v40 }
  0xf0   : > { %v586_v52 = vadd.f32 %v740_v42, %v573_v44  ;;  %v616_v6 = vadd.f32 %v742_v37, %v603_v59 }
  0xf1   : > { %v814_v47 = vpop.f32.mrb[6].mxu1  ;;  %v585_v53 = vadd.f32 %v740_v42, %v572_v49  ;;  %v794_v54 = vpop.f32.mrb[2].mxu0  ;;  %v615_v11 = vadd.f32 %v742_v37, %v602_v63 }
  0xf2   : > { %v558_v51 = vpop.f32.mrb[7].mxu1  ;;  %v620_v55 = vadd.f32 %v612_v43, %v586_v52  ;;  %v575_v57 = vmul.f32 %v794_v54, %v739_v38  ;;  %v395_v58 = vpop.f32.mrb[3].mxu0  ;;  %v605_v9 = vmul.f32 %v814_v47, %v741_v33 }
  0xf3   : > { %v619_v60 = vadd.f32 %v611_v48, %v585_v53  ;;  %v574_v62 = vmul.f32 %v739_v38, %v395_v58  ;;  %v604_v13 = vmul.f32 %v741_v33, %v558_v51 }
  0xf4   : > { %v628_v0 = vmax.f32 %v620_v55, 0.0  ;;  %v588_v1 = vadd.f32 %v740_v42, %v575_v57  ;;  %v618_v20 = vadd.f32 %v742_v37, %v605_v9 }
  0xf5   : > { %v627_v2 = vmax.f32 %v619_v60, 0.0  ;;  %v587_v3 = vadd.f32 %v740_v42, %v574_v62  ;;  %v797_v4 = vpop.f32.mrb[4].mxu0  ;;  %v617_v24 = vadd.f32 %v742_v37, %v604_v13 }
  0xf6   : > { %636 = vst [vmem:[%s972_s15 + $0x8] sm:$0xff] %v628_v0  ;;  %v622_v5 = vadd.f32 %v614_v56, %v588_v1  ;;  %v577_v7 = vmul.f32 %v797_v4, %v739_v38  ;;  %v405_v8 = vpop.f32.mrb[5].mxu0 }
  0xf7   : > { %635 = vst [vmem:[%s972_s15] sm:$0xff] %v627_v2  ;;  %v621_v10 = vadd.f32 %v613_v61, %v587_v3  ;;  %v576_v12 = vmul.f32 %v739_v38, %v405_v8 }
  0xf8   : > { %v630_v14 = vmax.f32 %v622_v5, 0.0  ;;  %v590_v15 = vadd.f32 %v740_v42, %v577_v7 }
  0xf9   : > { %v629_v16 = vmax.f32 %v621_v10, 0.0  ;;  %v589_v17 = vadd.f32 %v740_v42, %v576_v12  ;;  %v800_v18 = vpop.f32.mrb[6].mxu0 }
  0xfa   : > { %638 = vst [vmem:[%s972_s15 + $0x18] sm:$0xff] %v630_v14  ;;  %v624_v19 = vadd.f32 %v616_v6, %v590_v15  ;;  %v579_v21 = vmul.f32 %v800_v18, %v739_v38  ;;  %v415_v22 = vpop.f32.mrb[7].mxu0 }
  0xfb   : > { %637 = vst [vmem:[%s972_s15 + $0x10] sm:$0xff] %v629_v16  ;;  %v623_v23 = vadd.f32 %v615_v11, %v589_v17  ;;  %v578_v25 = vmul.f32 %v739_v38, %v415_v22 }
  0xfc   : > { %v632_v26 = vmax.f32 %v624_v19, 0.0  ;;  %v592_v27 = vadd.f32 %v740_v42, %v579_v21 }
  0xfd   : > { %v631_v28 = vmax.f32 %v623_v23, 0.0  ;;  %v591_v29 = vadd.f32 %v740_v42, %v578_v25 }
  0xfe   : > { %640 = vst [vmem:[%s972_s15 + $0x28] sm:$0xff] %v632_v26  ;;  %v626_v30 = vadd.f32 %v618_v20, %v592_v27 }
  0xff   : > { %639 = vst [vmem:[%s972_s15 + $0x20] sm:$0xff] %v631_v28  ;;  %v625_v31 = vadd.f32 %v617_v24, %v591_v29 }
 0x100   : > { %v634_v32 = vmax.f32 %v626_v30, 0.0 }
 0x101   : > { %v633_v33 = vmax.f32 %v625_v31, 0.0 }
 0x102   : > { %642 = vst [vmem:[%s972_s15 + $0x38] sm:$0xff] %v634_v32 }
 0x103   : > { %641 = vst [vmem:[%s972_s15 + $0x30] sm:$0xff] %v633_v33 }
 0x104 PF: > { %s16_s21 = sadd.s32 1, %s845_s21  }
 0x105   : > { %p13_p4 = scmp.ge.s32.totalorder %s16_s21, 4  }
 0x107   :  { %15 = sbr.rel (!%p13_p4) target bundleno = 1 (0x1), region = 77 }

// kernel: basic_block2_forward.6
= control target key start
LH: loop header
LB: loop body
LE: loop exit
PB: predicated region body
PF: predicated region fallthrough
CT: control target
= control target key end

     0   :  { %s888_s24 = smov 0   ;;  %s1007_s0 = inlined_call_operand.vmem [shape: f32[128,72], index: 0, kind: input, shape index: {}]   ;;  %s1008_s1 = inlined_call_operand.vmem [shape: f32[72,128], index: 1, kind: input, shape index: {}]   ;;  %s1009_s2 = inlined_call_operand.vmem [shape: f32[128,4], index: 2, kind: input, shape index: {}]   ;;  %s1010_s3 = inlined_call_operand.vmem [shape: f32[4,128], index: 3, kind: input, shape index: {}]   ;;  %s1011_s4 = inlined_call_operand.vmem [shape: f32[1,128], index: 4, kind: output, shape index: {0}]   ;;  %s1012_s5 = inlined_call_operand.vmem [shape: f32[1,128], index: 5, kind: output, shape index: {1}]   ;;  %s1013_s6 = inlined_call_operand.vmem [shape: f32[1,128], index: 6, kind: output, shape index: {2}]   ;;  %s1014_s7 = inlined_call_operand.vmem [shape: f32[1,128], index: 7, kind: output, shape index: {3}]  }
   0x1 LB: > { %s716_s25 = sadd.s32 4294967295, %s845_s24   ;;  %p719_p0 = scmp.ge.s32.totalorder %s845_s24, 1  ;;  %s845_s24 = sphi %s888_s24, %s18_s24  }
   0x2   : > { %p236_p1 = scmp.lt.s32.totalorder %s845_s24, 3 }
   0x4   : > { %p237_p2 = pnand %p719_p0, %p236_p1 }
   0x5   : > { %s720_s26 = sshll.u32 (!%p237_p2), %s716_s25, 3  ;;  %p724_p4 = scmp.ne.s32.totalorder (!%p237_p2), %s716_s25, 0 }
   0x6   : > { %240 = sbr.rel (%p237_p2) target bundleno = 288 (0x120), region = 36  ;;  %p269_p3 = scmp.lt.s32.totalorder (!%p237_p2), %s720_s26, 15 }
   0xd   : > { %s1016_s26 = smov (!%p269_p3, %s720_s26), 15  ;;  %283 = sbr.rel (%p724_p4) target bundleno = 20 (0x14), region = 40 }
   0xe   : > { %s721_s27 = sshll.u32 %s1016_s26, 3  ;;  %v847_v0 = vmov (!%p724_p4), 0.0  }
   0xf   : > { %s899_s30 = scalar_lea.vmem %s1007_s0, %s721_s27  ;;  %s904_s10 = scalar_lea.vmem %s1009_s2, %s721_s27  ;;  %284 = vst [vmem:[%s1011_s4] sm:$0x1] (!%p724_p4), %v847_v0  ;;  %285 = vst [vmem:[%s1012_s5] sm:$0x1] (!%p724_p4), %v847_v0 }
  0x10   : > { %286 = vst [vmem:[%s1013_s6] sm:$0x1] (!%p724_p4), %v847_v0  ;;  %287 = vst [vmem:[%s1014_s7] sm:$0x1] (!%p724_p4), %v847_v0 }
  0x14 PF: > { %v296_v1 = vld [vmem:[%s1008_s1] sm:$0xff]  ;;  %v297_v2 = vld [vmem:[%s1008_s1 + $0x8] sm:$0xff]  ;;  %v298_v3 = vld [vmem:[%s1008_s1 + $0x10] sm:$0xff]  ;;  %vm469_vm0 = vcmask 1043456   ;;  %vm444_vm1 = vcmask 31744   ;;  %vm305_vm2 = vcmask 588800  }
  0x15   : > { %v814_v4 = vpack.c.bf16 %v297_v2, %v296_v1  ;;  %v299_v5 = vld [vmem:[%s1008_s1 + $0x18] sm:$0xff]  ;;  %v443_v6 = vld [vmem:[%s1010_s3] sm:$0xf]  ;;  %v301_v9 = vld [vmem:[%s1008_s1 + $0x28] sm:$0xff] }
  0x16   : > { %v300_v7 = vld [vmem:[%s1008_s1 + $0x20] sm:$0xff]  ;;  %v818_v8 = vpack.c.bf16 %v299_v5, %v298_v3  ;;  %800 = vmatprep.subr.msk.mxu1 %vm469_vm0, %v443_v6  ;;  %v436_v11 = vld [vmem:[%s904_s10 + $0x8] sm:$0xff]  ;;  %v437_v12 = vld [vmem:[%s904_s10 + $0x10] sm:$0xff] }
  0x17   : > { %v435_v10 = vld [vmem:[%s904_s10] sm:$0xff]  ;;  %815 = vmatprep.subr.bf16.mxu0 %v814_v4  ;;  %801 = vmatpush3.msk.msra.mxu1 %vm469_vm0, %v443_v6  ;;  %v822_v13 = vpack.c.bf16 %v301_v9, %v300_v7  ;;  %v302_v15 = vld [vmem:[%s1008_s1 + $0x30] sm:$0xff]  ;;  %v303_v16 = vld [vmem:[%s1008_s1 + $0x38] sm:$0xff] }
  0x18   : > { %817 = vmatpush3.bf16.msra.mxu0 %v814_v4  ;;  %802 = vmatprep.mubr.msk.f32.mxu1 %vm444_vm1, %v435_v10  ;;  %v288_v14 = vld [vmem:[%s899_s30] sm:$0xff]  ;;  %v438_v17 = vld [vmem:[%s904_s10 + $0x18] sm:$0xff]  ;;  %v826_v19 = vpack.c.bf16 %v303_v16, %v302_v15  ;;  %v440_v20 = vld [vmem:[%s904_s10 + $0x28] sm:$0xff] }
  0x19   : > { %819 = vmatprep.subr.bf16.mxu0 %v818_v8  ;;  %803 = vmatmul.mubr.msk.f32.vlgmr.msra.gmra.mrb[0].mxu1 %vm444_vm1, %v436_v11  ;;  %v439_v18 = vld [vmem:[%s904_s10 + $0x20] sm:$0xff]  ;;  %v441_v21 = vld [vmem:[%s904_s10 + $0x30] sm:$0xff]  ;;  %v442_v23 = vld [vmem:[%s904_s10 + $0x38] sm:$0xff] }
  0x1a   : > { %805 = vmatprep.mubr.msk.f32.mxu1 %vm444_vm1, %v437_v12  ;;  %788 = vmatprep.mubr.msk.f32.mxu0 %vm305_vm2, %v288_v14  ;;  %v304_v22 = vld [vmem:[%s1008_s1 + $0x40] sm:$0xff]  ;;  %v289_v24 = vld [vmem:[%s899_s30 + $0x8] sm:$0xff]  ;;  %v290_v25 = vld [vmem:[%s899_s30 + $0x10] sm:$0xff] }
  0x1b   : > { %v291_v26 = vld [vmem:[%s899_s30 + $0x18] sm:$0xff]  ;;  %v292_v27 = vld [vmem:[%s899_s30 + $0x20] sm:$0xff]  ;;  %v293_v28 = vld [vmem:[%s899_s30 + $0x28] sm:$0xff] }
  0x1c   : > { %821 = vmatpush3.bf16.msra.mxu0 %v818_v8  ;;  %v294_v29 = vld [vmem:[%s899_s30 + $0x30] sm:$0xff]  ;;  %v295_v30 = vld [vmem:[%s899_s30 + $0x38] sm:$0xff] }
  0x1d   : > { %823 = vmatprep.subr.bf16.mxu0 %v822_v13  ;;  %806 = vmatmul.mubr.msk.f32.gmra.mrb[2].mxu1 %vm444_vm1, %v438_v17 }
  0x1e   : > { %808 = vmatprep.mubr.msk.f32.mxu1 %vm444_vm1, %v439_v18 }
  0x20   : > { %825 = vmatpush3.bf16.msra.mxu0 %v822_v13 }
  0x21   : > { %827 = vmatprep.subr.bf16.mxu0 %v826_v19  ;;  %809 = vmatmul.mubr.msk.f32.gmra.mrb[4].mxu1 %vm444_vm1, %v440_v20 }
  0x22   : > { %811 = vmatprep.mubr.msk.f32.mxu1 %vm444_vm1, %v441_v21 }
  0x24   : > { %829 = vmatpush3.bf16.msra.mxu0 %v826_v19 }
  0x25   : > { %786 = vmatprep.subr.mxu0 %v304_v22  ;;  %812 = vmatmul.mubr.msk.f32.gmra.mrb[6].mxu1 %vm444_vm1, %v442_v23  ;;  %v618_v23 = vld [vmem:[%s1013_s6] sm:$0x1] }
  0x28   : > { %787 = vmatpush3.msra.mxu0 %v304_v22 }
  0x29   : > { %789 = vmatmul.mubr.msk.f32.vlgmr.msra.gmra.mrb[0].mxu0 %vm305_vm2, %v289_v24 }
  0x2a   : > { %791 = vmatprep.mubr.msk.f32.mxu0 %vm305_vm2, %v290_v25 }
  0x2d   : > { %792 = vmatmul.mubr.msk.f32.gmra.mrb[2].mxu0 %vm305_vm2, %v291_v26 }
  0x2e   : > { %794 = vmatprep.mubr.msk.f32.mxu0 %vm305_vm2, %v292_v27 }
  0x31   : > { %795 = vmatmul.mubr.msk.f32.gmra.mrb[4].mxu0 %vm305_vm2, %v293_v28 }
  0x32   : > { %797 = vmatprep.mubr.msk.f32.mxu0 %vm305_vm2, %v294_v29  ;;  %v634_v29 = vld [vmem:[%s1014_s7] sm:$0x1] }
  0x35   : > { %798 = vmatmul.mubr.msk.f32.gmra.mrb[6].mxu0 %vm305_vm2, %v295_v30 }
  0xec   : > { %v804_v31 = vpop.f32.mrb[0].mxu1 }
  0xed   : > { %v636_v32 = vmul.f32 %v804_v31, %v804_v31  ;;  %v539_v33 = vpop.f32.mrb[1].mxu1 }
  0xee   : > { %v619_v34 = vadd.f32 %v804_v31, %v539_v33  ;;  %v635_v35 = vmul.f32 %v539_v33, %v539_v33 }
  0xf0   : > { %v643_v36 = vadd.f32 %v636_v32, %v635_v35  ;;  %v807_v37 = vpop.f32.mrb[2].mxu1 }
  0xf1   : > { %v549_v38 = vpop.f32.mrb[3].mxu1  ;;  %v638_v39 = vmul.f32 %v807_v37, %v807_v37 }
  0xf2   : > { %v620_v40 = vadd.f32 %v619_v34, %v549_v38  ;;  %v637_v41 = vmul.f32 %v549_v38, %v549_v38 }
  0xf4   : > { %v644_v42 = vadd.f32 %v643_v36, %v637_v41  ;;  %v810_v43 = vpop.f32.mrb[4].mxu1  ;;  %v621_v44 = vadd.f32 %v807_v37, %v620_v40 }
  0xf5   : > { %v559_v45 = vpop.f32.mrb[5].mxu1  ;;  %v640_v46 = vmul.f32 %v810_v43, %v810_v43 }
  0xf6   : > { %v622_v47 = vadd.f32 %v621_v44, %v559_v45  ;;  %v639_v48 = vmul.f32 %v559_v45, %v559_v45  ;;  %v645_v49 = vadd.f32 %v644_v42, %v638_v39 }
  0xf8   : > { %v646_v50 = vadd.f32 %v645_v49, %v639_v48  ;;  %v813_v51 = vpop.f32.mrb[6].mxu1  ;;  %v623_v52 = vadd.f32 %v810_v43, %v622_v47 }
  0xf9   : > { %v569_v53 = vpop.f32.mrb[7].mxu1  ;;  %v642_v54 = vmul.f32 %v813_v51, %v813_v51 }
  0xfa   : > { %v624_v55 = vadd.f32 %v623_v52, %v569_v53  ;;  %v641_v56 = vmul.f32 %v569_v53, %v569_v53  ;;  %v647_v57 = vadd.f32 %v646_v50, %v640_v46 }
  0xfc   : > { %v790_v58 = vpop.f32.mrb[0].mxu0  ;;  %v625_v59 = vadd.f32 %v813_v51, %v624_v55  ;;  %v648_v60 = vadd.f32 %v647_v57, %v641_v56  ;;  %v578_v51 = vld [vmem:[%s1011_s4] sm:$0x1] }
  0xfd   : > { %v596_v61 = vmul.f32 %v790_v58, %v790_v58  ;;  %v396_v62 = vpop.f32.mrb[1].mxu0  ;;  %v594_v56 = vld [vmem:[%s1012_s5] sm:$0x1] }
  0xfe   : > { %v579_v63 = vadd.f32 %v790_v58, %v396_v62  ;;  %v595_v0 = vmul.f32 %v396_v62, %v396_v62  ;;  %v626_v1 = vrot.slane %v625_v59, 4  ;;  %v649_v2 = vadd.f32 %v648_v60, %v642_v54 }
 0x100   : > { %v603_v3 = vadd.f32 %v596_v61, %v595_v0  ;;  %v793_v4 = vpop.f32.mrb[2].mxu0  ;;  %v627_v5 = vadd.f32 %v626_v1, %v625_v59  ;;  %v650_v6 = vrot.slane %v649_v2, 4 }
 0x101   : > { %v406_v7 = vpop.f32.mrb[3].mxu0  ;;  %v598_v17 = vmul.f32 %v793_v4, %v793_v4 }
 0x102   : > { %v628_v8 = vrot.slane %v627_v5, 2  ;;  %v651_v9 = vadd.f32 %v650_v6, %v649_v2  ;;  %v580_v10 = vadd.f32 %v579_v63, %v406_v7  ;;  %v597_v11 = vmul.f32 %v406_v7, %v406_v7 }
 0x104   : > { %v629_v12 = vadd.f32 %v628_v8, %v627_v5  ;;  %v652_v13 = vrot.slane %v651_v9, 2  ;;  %v604_v14 = vadd.f32 %v603_v3, %v597_v11  ;;  %v796_v15 = vpop.f32.mrb[4].mxu0  ;;  %v581_v16 = vadd.f32 %v793_v4, %v580_v10 }
 0x105   : > { %v416_v18 = vpop.f32.mrb[5].mxu0  ;;  %v600_v30 = vmul.f32 %v796_v15, %v796_v15 }
 0x106   : > { %v630_v19 = vrot.slane %v629_v12, 1  ;;  %v653_v20 = vadd.f32 %v652_v13, %v651_v9  ;;  %v582_v21 = vadd.f32 %v581_v16, %v416_v18  ;;  %v599_v22 = vmul.f32 %v416_v18, %v416_v18 }
 0x107   : > { %v605_v24 = vadd.f32 %v604_v14, %v598_v17 }
 0x108   : > { %v631_v25 = vadd.f32 %v630_v19, %v629_v12  ;;  %v654_v26 = vrot.slane %v653_v20, 1  ;;  %v799_v27 = vpop.f32.mrb[6].mxu0  ;;  %v583_v28 = vadd.f32 %v796_v15, %v582_v21 }
 0x109   : > { %v606_v31 = vadd.f32 %v605_v24, %v599_v22  ;;  %v426_v32 = vpop.f32.mrb[7].mxu0  ;;  %v602_v40 = vmul.f32 %v799_v27, %v799_v27 }
 0x10a   : > { %v632_v33 = vadd.f32 %v631_v25, %v618_v23  ;;  %v655_v34 = vadd.f32 %v654_v26, %v653_v20  ;;  %v584_v35 = vadd.f32 %v583_v28, %v426_v32  ;;  %v601_v36 = vmul.f32 %v426_v32, %v426_v32 }
 0x10b   : > { %v607_v37 = vadd.f32 %v606_v31, %v600_v30 }
 0x10c   : > { %633 = vst [vmem:[%s1013_s6] sm:$0x1] %v632_v33  ;;  %v656_v38 = vadd.f32 %v655_v34, %v634_v29  ;;  %v585_v39 = vadd.f32 %v799_v27, %v584_v35 }
 0x10d   : > { %v608_v41 = vadd.f32 %v607_v37, %v601_v36 }
 0x10e   : > { %657 = vst [vmem:[%s1014_s7] sm:$0x1] %v656_v38  ;;  %v586_v42 = vrot.slane %v585_v39, 4 }
 0x10f   : > { %v609_v43 = vadd.f32 %v608_v41, %v602_v40 }
 0x110   : > { %v587_v44 = vadd.f32 %v586_v42, %v585_v39 }
 0x111   : > { %v610_v45 = vrot.slane %v609_v43, 4 }
 0x112   : > { %v588_v46 = vrot.slane %v587_v44, 2 }
 0x113   : > { %v611_v47 = vadd.f32 %v610_v45, %v609_v43 }
 0x114   : > { %v589_v48 = vadd.f32 %v588_v46, %v587_v44 }
 0x115   : > { %v612_v49 = vrot.slane %v611_v47, 2 }
 0x116   : > { %v590_v50 = vrot.slane %v589_v48, 1 }
 0x117   : > { %v613_v52 = vadd.f32 %v612_v49, %v611_v47 }
 0x118   : > { %v591_v53 = vadd.f32 %v590_v50, %v589_v48 }
 0x119   : > { %v614_v54 = vrot.slane %v613_v52, 1 }
 0x11a   : > { %v592_v55 = vadd.f32 %v591_v53, %v578_v51 }
 0x11b   : > { %v615_v57 = vadd.f32 %v614_v54, %v613_v52 }
 0x11c   : > { %593 = vst [vmem:[%s1011_s4] sm:$0x1] %v592_v55 }
 0x11d   : > { %v616_v58 = vadd.f32 %v615_v57, %v594_v56 }
 0x11f   : > { %617 = vst [vmem:[%s1012_s5] sm:$0x1] %v616_v58 }
 0x120 PF: > { %s18_s24 = sadd.s32 1, %s845_s24  }
 0x121   : > { %p15_p5 = scmp.ge.s32.totalorder %s18_s24, 4  }
 0x123   :  { %17 = sbr.rel (!%p15_p5) target bundleno = 1 (0x1), region = 93 }

</bundles_post_ra>
